<compile_context>
chip_gen: v7x
topology: tpu7x:2x2x1
jax: 0.10.0
libtpu: 0.0.40
codegen_flags: <defaults>
</compile_context>

<pallas_src>
import jax
import jax.numpy as jnp
from jax.experimental import pallas as pl
from jax.experimental.pallas import tpu as pltpu

EPS = 1e-5
LANE = 128


def _round_up(n, m):
    return -(-n // m) * m


def _pick_band_rows(h):
    """Output rows per grid step (must divide H)."""
    for b in (8, 16, 32):
        if h % b == 0:
            return b
    for b in range(min(h, 32), 0, -1):
        if h % b == 0:
            return b
    return h


def _to_bands(x_nhwc, bh):
    """(N, H, W, C) -> (N, G, bh+2, W+2, C).

    Zero-pad spatially (padding=1) and restructure into non-overlapping row
    bands that *include* their 1-row halo, so every grid step gets a plain
    rectangular block and BlockSpec auto-pipelining stays in play."""
    n, h, w, c = x_nhwc.shape
    g = h // bh
    xp = jnp.pad(x_nhwc, ((0, 0), (1, 1), (1, 1), (0, 0)))
    idx = (jnp.arange(g) * bh)[:, None] + jnp.arange(bh + 2)[None, :]
    return jnp.take(xp, idx, axis=1)


def _compiler_params(per_step_bytes, resident_bytes):
    try:
        cap = int(pltpu.get_tpu_info().vmem_capacity_bytes)
    except Exception:
        cap = 64 << 20                      # conservative (v7x: 64 MiB / TC)
    want = int(resident_bytes + 2 * per_step_bytes + (8 << 20))  # 2x: double buffering
    limit = max(16 << 20, min(want, cap - (8 << 20)))
    return pltpu.CompilerParams(
        dimension_semantics=("parallel", "parallel"),
        vmem_limit_bytes=int(limit))


def _make_conv_band_kernel(*, bh, width, g_bands, cout_p, apply_bn_relu, conv_dtype):
    """3x3 conv over one haloed row band; optionally applies the previous
    BatchNorm's scale/shift + ReLU to the input on the fly."""
    rows = bh * width

    def kernel(x_ref, w_ref, *rest):
        if apply_bn_relu:
            scale_ref, shift_ref, y_ref, stats_ref = rest
            scale = scale_ref[...]                      # (1, Cin_p)
            shift = shift_ref[...]
            g = pl.program_id(1)
        else:
            y_ref, stats_ref = rest

        acc = None
        for kh in range(3):
            for kw in range(3):
                # Ref slice per tap: streamed loads, no im2col patch, no
                # whole-block load into vregs.
                xs = x_ref[0, 0, kh:kh + bh, kw:kw + width, :]   # (bh, W, Cin_p)
                if apply_bn_relu:
                    # BN1 scale/shift + ReLU applied on the fly; zero the taps
                    # that land on true spatial padding (the zero halo of y1
                    # would otherwise become relu(shift) != 0).
                    a = jnp.maximum(xs * scale + shift, 0.0)
                    ok = None
                    if kh == 0 or kh == 2:
                        r = jax.lax.broadcasted_iota(jnp.int32, (bh, width, 1), 0)
                        if kh == 0:
                            ok = (r > 0) | (g > 0)
                        else:
                            ok = (r < bh - 1) | (g < g_bands - 1)
                    if kw == 0 or kw == 2:
                        c = jax.lax.broadcasted_iota(jnp.int32, (bh, width, 1), 1)
                        okc = (c > 0) if kw == 0 else (c < width - 1)
                        ok = okc if ok is None else (ok & okc)
                    if ok is not None:
                        a = jnp.where(ok, a, 0.0)
                    xs = a
                tap = xs.reshape(rows, xs.shape[-1]).astype(conv_dtype)
                wt = w_ref[kh, kw]                               # (Cin_p, Cout_p)
                part = jnp.dot(tap, wt, preferred_element_type=jnp.float32)
                acc = part if acc is None else acc + part        # f32 accumulate

        y_ref[...] = acc.reshape(1, bh, width, cout_p)

        # Per-band partial BatchNorm statistics (finalized by the wrapper).
        s = jnp.sum(acc, axis=0, keepdims=True)                  # (1, Cout_p)
        sq = jnp.sum(acc * acc, axis=0, keepdims=True)           # (1, Cout_p)
        stats_ref[...] = jnp.concatenate([s, sq], axis=0).reshape(1, 1, 2, cout_p)

    return kernel


def _conv_band_call(x_bands, w, scale_shift, *, n, h, width, bh, cout_p, conv_dtype):
    g_bands = h // bh
    cin_p = x_bands.shape[-1]
    apply_bn_relu = scale_shift is not None

    kernel = _make_conv_band_kernel(
        bh=bh, width=width, g_bands=g_bands, cout_p=cout_p,
        apply_bn_relu=apply_bn_relu, conv_dtype=conv_dtype)

    in_specs = [
        pl.BlockSpec((1, 1, bh + 2, width + 2, cin_p), lambda i, j: (i, j, 0, 0, 0)),
        pl.BlockSpec(w.shape, lambda i, j: (0, 0, 0, 0)),        # resident weights
    ]
    args = [x_bands, w]
    if apply_bn_relu:
        in_specs += [pl.BlockSpec((1, cin_p), lambda i, j: (0, 0)),
                     pl.BlockSpec((1, cin_p), lambda i, j: (0, 0))]
        args += [scale_shift[0], scale_shift[1]]

    out_shape = (
        jax.ShapeDtypeStruct((n, h, width, cout_p), jnp.float32),    # raw conv output
        jax.ShapeDtypeStruct((n, g_bands, 2, cout_p), jnp.float32),  # per-band sum/sumsq
    )
    out_specs = [
        pl.BlockSpec((1, bh, width, cout_p), lambda i, j: (i, j, 0, 0)),
        pl.BlockSpec((1, 1, 2, cout_p), lambda i, j: (i, j, 0, 0)),
    ]

    w_bpe = jnp.dtype(conv_dtype).itemsize
    per_step = 4 * ((bh + 2) * (width + 2) * cin_p + bh * width * cout_p + 2 * cout_p)
    resident = w_bpe * 9 * cin_p * cout_p + 4 * 4 * cin_p

    return pl.pallas_call(
        kernel,
        out_shape=out_shape,
        grid_spec=pltpu.PrefetchScalarGridSpec(
            num_scalar_prefetch=0,
            grid=(n, g_bands),
            in_specs=in_specs,
            out_specs=out_specs),
        compiler_params=_compiler_params(per_step, resident),
    )(*args)


def _bn_finalize(stats, gamma_p, beta_p, count):
    """Reduce per-band partial stats -> per-channel scale/shift (training-mode BN)."""
    s = jnp.sum(stats[:, :, 0, :], axis=(0, 1))
    sq = jnp.sum(stats[:, :, 1, :], axis=(0, 1))
    mean = s / count
    var = jnp.maximum(sq / count - mean * mean, 0.0)   # clamp: cancellation guard
    scale = gamma_p[0] * jax.lax.rsqrt(var + EPS)
    shift = beta_p[0] - mean * scale
    return scale.reshape(1, -1), shift.reshape(1, -1)


def _bn_relu_kernel(y_ref, scale_ref, shift_ref, o_ref):
    o_ref[...] = jnp.maximum(y_ref[...] * scale_ref[...] + shift_ref[...], 0.0)


def _bn_relu_call(y, scale, shift, *, bh):
    n, h, width, cp = y.shape
    g_bands = h // bh
    per_step = 4 * 2 * bh * width * cp
    resident = 4 * 2 * cp
    return pl.pallas_call(
        _bn_relu_kernel,
        out_shape=jax.ShapeDtypeStruct(y.shape, jnp.float32),
        grid_spec=pltpu.PrefetchScalarGridSpec(
            num_scalar_prefetch=0,
            grid=(n, g_bands),
            in_specs=[pl.BlockSpec((1, bh, width, cp), lambda i, j: (i, j, 0, 0)),
                      pl.BlockSpec((1, cp), lambda i, j: (0, 0)),
                      pl.BlockSpec((1, cp), lambda i, j: (0, 0))],
            out_specs=pl.BlockSpec((1, bh, width, cp), lambda i, j: (i, j, 0, 0))),
        compiler_params=_compiler_params(per_step, resident),
    )(y, scale, shift)


def double_conv(x_nchw, params, *, band_rows=None, conv_dtype=jnp.float32):
    """x_nchw: (N, Cin, H, W) f32 -> (N, Cout, H, W) f32.

    params = (w1, gamma1, beta1, w2, gamma2, beta2), PyTorch layouts:
      w*: (Cout, Cin, 3, 3); gamma*/beta*: (C,).
    Conv biases omitted: exactly cancelled by training-mode BatchNorm.
    On v6e/v7x pass conv_dtype=jnp.bfloat16 for the MXU matmuls (BN stays f32).
    """
    w1, g1, be1, w2, g2, be2 = params
    n, cin, h, width = x_nchw.shape
    cmid, cout = w1.shape[0], w2.shape[0]
    cin_p = _round_up(cin, LANE)
    cmid_p = _round_up(cmid, LANE)
    cout_p = _round_up(cout, LANE)

    bh = band_rows if band_rows is not None else _pick_band_rows(h)
    assert h % bh == 0, "band_rows must divide H"

    def prep_w(wt, ci_p, co_p):
        # (Cout, Cin, 3, 3) -> (3, 3, Cin_p, Cout_p) with zero-padded channels.
        wr = jnp.transpose(wt, (2, 3, 1, 0)).astype(jnp.float32)
        wr = jnp.pad(wr, ((0, 0), (0, 0),
                          (0, ci_p - wr.shape[2]), (0, co_p - wr.shape[3])))
        return wr.astype(conv_dtype)

    def prep_vec(v, cp):
        return jnp.pad(v.astype(jnp.float32).reshape(1, -1),
                       ((0, 0), (0, cp - v.shape[0])))

    w1p = prep_w(w1, cin_p, cmid_p)
    w2p = prep_w(w2, cmid_p, cout_p)
    g1p, be1p = prep_vec(g1, cmid_p), prep_vec(be1, cmid_p)
    g2p, be2p = prep_vec(g2, cout_p), prep_vec(be2, cout_p)

    # NCHW -> NHWC, channels zero-padded to lane width (lane-dense ld/st and
    # full MXU contraction/output even for tiny channel counts).
    x = jnp.transpose(x_nchw, (0, 2, 3, 1)).astype(jnp.float32)
    x = jnp.pad(x, ((0, 0), (0, 0), (0, 0), (0, cin_p - cin)))

    count = float(n * h * width)

    # conv1: raw conv output + per-band BN1 partial stats.
    y1, st1 = _conv_band_call(_to_bands(x, bh), w1p, None,
                              n=n, h=h, width=width, bh=bh,
                              cout_p=cmid_p, conv_dtype=conv_dtype)
    scale1, shift1 = _bn_finalize(st1, g1p, be1p, count)

    # conv2: BN1+ReLU applied to the haloed y1 bands inside the kernel.
    y2, st2 = _conv_band_call(_to_bands(y1, bh), w2p, (scale1, shift1),
                              n=n, h=h, width=width, bh=bh,
                              cout_p=cout_p, conv_dtype=conv_dtype)
    scale2, shift2 = _bn_finalize(st2, g2p, be2p, count)

    # BN2 + ReLU (gridded elementwise pass).
    out_p = _bn_relu_call(y2, scale2, shift2, bh=bh)

    out = out_p[..., :cout]
    return jnp.transpose(out, (0, 3, 1, 2))


def make_params(key, in_channels, out_channels):
    """Deterministic synthetic parameters in PyTorch layouts (biases omitted)."""
    ks = jax.random.split(key, 6)
    w1 = 0.1 * jax.random.normal(ks[0], (out_channels, in_channels, 3, 3), jnp.float32)
    g1 = 1.0 + 0.05 * jax.random.normal(ks[1], (out_channels,), jnp.float32)
    be1 = 0.05 * jax.random.normal(ks[2], (out_channels,), jnp.float32)
    w2 = 0.1 * jax.random.normal(ks[3], (out_channels, out_channels, 3, 3), jnp.float32)
    g2 = 1.0 + 0.05 * jax.random.normal(ks[4], (out_channels,), jnp.float32)
    be2 = 0.05 * jax.random.normal(ks[5], (out_channels,), jnp.float32)
    return (w1, g1, be1, w2, g2, be2)


def _reference_double_conv(x_nchw, params):
    """Pure-JAX reference (training-mode BatchNorm, biased variance)."""
    w1, g1, be1, w2, g2, be2 = params

    def conv(x, wt):
        return jax.lax.conv_general_dilated(
            x, wt, window_strides=(1, 1), padding=((1, 1), (1, 1)),
            dimension_numbers=("NCHW", "OIHW", "NCHW"),
            precision=jax.lax.Precision.HIGHEST)

    def bn_relu(y, gamma, beta):
        mean = jnp.mean(y, axis=(0, 2, 3), keepdims=True)
        var = jnp.var(y, axis=(0, 2, 3), keepdims=True)
        yn = (y - mean) * jax.lax.rsqrt(var + EPS)
        return jnp.maximum(yn * gamma.reshape(1, -1, 1, 1)
                           + beta.reshape(1, -1, 1, 1), 0.0)

    a1 = bn_relu(conv(x_nchw, w1), g1, be1)
    return bn_relu(conv(a1, w2), g2, be2)


if __name__ == "__main__":
    key = jax.random.PRNGKey(0)
    k_x, k_p = jax.random.split(key)

    N, Cin, H, W = 2, 4, 16, 16
    Cout = 8

    x = jax.random.normal(k_x, (N, Cin, H, W), jnp.float32)
    params = make_params(k_p, Cin, Cout)

    out = double_conv(x, params)           # conv_dtype=jnp.bfloat16 on v6e/v7x
    jax.block_until_ready(out)
    assert out.shape == (N, Cout, H, W)

    ref = _reference_double_conv(x, params)
    max_err = float(jnp.max(jnp.abs(out - ref)))
    assert max_err < 2e-2, f"mismatch vs reference: max abs err = {max_err}"

    print("KERNEL_OK")
</pallas_src>

<mosaic_0001>
module attributes {stable_mosaic.version = 11 : i64} {
  func.func @kernel(%arg0: i32, %arg1: i32, %arg2: memref<1x1x10x18x128xf32, #tpu.memory_space<vmem>>, %arg3: memref<3x3x128x128xf32, #tpu.memory_space<vmem>>, %arg4: memref<1x8x16x128xf32, #tpu.memory_space<vmem>>, %arg5: memref<1x1x2x128xf32, #tpu.memory_space<vmem>>) attributes {dimension_semantics = [#tpu.dimension_semantics<parallel>, #tpu.dimension_semantics<parallel>], iteration_bounds = array<i64: 2, 2>, scalar_prefetch = 0 : i64, scratch_operands = 0 : i64, tpu.core_type = #tpu.core_type<tc>, window_params = [{transform_indices = @transform_0, window_bounds = array<i64: 1, 1, 10, 18, 128>}, {pipeline_mode = #tpu.pipeline_mode<synchronous>, transform_indices = @transform_1, window_bounds = array<i64: 3, 3, 128, 128>}, {transform_indices = @transform_2, window_bounds = array<i64: 1, 8, 16, 128>}, {transform_indices = @transform_3, window_bounds = array<i64: 1, 1, 2, 128>}]} {
    %c0 = arith.constant 0 : index
    %c0_0 = arith.constant 0 : index
    %c0_1 = arith.constant 0 : index
    %c0_2 = arith.constant 0 : index
    %c0_3 = arith.constant 0 : index
    %0 = vector.load %arg2[%c0, %c0_0, %c0_1, %c0_2, %c0_3] : memref<1x1x10x18x128xf32, #tpu.memory_space<vmem>>, vector<1x1x8x16x128xf32>
    %1 = vector.shape_cast %0 : vector<1x1x8x16x128xf32> to vector<8x16x128xf32>
    %2 = vector.shape_cast %1 : vector<8x16x128xf32> to vector<128x128xf32>
    %c0_4 = arith.constant 0 : index
    %c0_5 = arith.constant 0 : index
    %c0_6 = arith.constant 0 : index
    %c0_7 = arith.constant 0 : index
    %3 = vector.load %arg3[%c0_4, %c0_5, %c0_6, %c0_7] : memref<3x3x128x128xf32, #tpu.memory_space<vmem>>, vector<1x1x128x128xf32>
    %4 = vector.shape_cast %3 : vector<1x1x128x128xf32> to vector<128x128xf32>
    %cst = arith.constant dense<0.000000e+00> : vector<128x128xf32>
    %5 = tpu.matmul %2, %4, %cst {dimension_numbers = #tpu.dot_dimension_numbers<[1], [0], [0], [1], [0, 0, 1, 1], [], []>} : vector<128x128xf32>, vector<128x128xf32>, vector<128x128xf32> -> vector<128x128xf32>
    %c0_8 = arith.constant 0 : index
    %c0_9 = arith.constant 0 : index
    %c0_10 = arith.constant 0 : index
    %c1 = arith.constant 1 : index
    %c0_11 = arith.constant 0 : index
    %6 = vector.load %arg2[%c0_8, %c0_9, %c0_10, %c1, %c0_11] : memref<1x1x10x18x128xf32, #tpu.memory_space<vmem>>, vector<1x1x8x16x128xf32>
    %7 = vector.shape_cast %6 : vector<1x1x8x16x128xf32> to vector<8x16x128xf32>
    %8 = vector.shape_cast %7 : vector<8x16x128xf32> to vector<128x128xf32>
    %c0_12 = arith.constant 0 : index
    %c1_13 = arith.constant 1 : index
    %c0_14 = arith.constant 0 : index
    %c0_15 = arith.constant 0 : index
    %9 = vector.load %arg3[%c0_12, %c1_13, %c0_14, %c0_15] : memref<3x3x128x128xf32, #tpu.memory_space<vmem>>, vector<1x1x128x128xf32>
    %10 = vector.shape_cast %9 : vector<1x1x128x128xf32> to vector<128x128xf32>
    %cst_16 = arith.constant dense<0.000000e+00> : vector<128x128xf32>
    %11 = tpu.matmul %8, %10, %cst_16 {dimension_numbers = #tpu.dot_dimension_numbers<[1], [0], [0], [1], [0, 0, 1, 1], [], []>} : vector<128x128xf32>, vector<128x128xf32>, vector<128x128xf32> -> vector<128x128xf32>
    %12 = arith.addf %5, %11 : vector<128x128xf32>
    %c0_17 = arith.constant 0 : index
    %c0_18 = arith.constant 0 : index
    %c0_19 = arith.constant 0 : index
    %c2 = arith.constant 2 : index
    %c0_20 = arith.constant 0 : index
    %13 = vector.load %arg2[%c0_17, %c0_18, %c0_19, %c2, %c0_20] : memref<1x1x10x18x128xf32, #tpu.memory_space<vmem>>, vector<1x1x8x16x128xf32>
    %14 = vector.shape_cast %13 : vector<1x1x8x16x128xf32> to vector<8x16x128xf32>
    %15 = vector.shape_cast %14 : vector<8x16x128xf32> to vector<128x128xf32>
    %c0_21 = arith.constant 0 : index
    %c2_22 = arith.constant 2 : index
    %c0_23 = arith.constant 0 : index
    %c0_24 = arith.constant 0 : index
    %16 = vector.load %arg3[%c0_21, %c2_22, %c0_23, %c0_24] : memref<3x3x128x128xf32, #tpu.memory_space<vmem>>, vector<1x1x128x128xf32>
    %17 = vector.shape_cast %16 : vector<1x1x128x128xf32> to vector<128x128xf32>
    %cst_25 = arith.constant dense<0.000000e+00> : vector<128x128xf32>
    %18 = tpu.matmul %15, %17, %cst_25 {dimension_numbers = #tpu.dot_dimension_numbers<[1], [0], [0], [1], [0, 0, 1, 1], [], []>} : vector<128x128xf32>, vector<128x128xf32>, vector<128x128xf32> -> vector<128x128xf32>
    %19 = arith.addf %12, %18 : vector<128x128xf32>
    %c0_26 = arith.constant 0 : index
    %c0_27 = arith.constant 0 : index
    %c1_28 = arith.constant 1 : index
    %c0_29 = arith.constant 0 : index
    %c0_30 = arith.constant 0 : index
    %20 = vector.load %arg2[%c0_26, %c0_27, %c1_28, %c0_29, %c0_30] : memref<1x1x10x18x128xf32, #tpu.memory_space<vmem>>, vector<1x1x8x16x128xf32>
    %21 = vector.shape_cast %20 : vector<1x1x8x16x128xf32> to vector<8x16x128xf32>
    %22 = vector.shape_cast %21 : vector<8x16x128xf32> to vector<128x128xf32>
    %c1_31 = arith.constant 1 : index
    %c0_32 = arith.constant 0 : index
    %c0_33 = arith.constant 0 : index
    %c0_34 = arith.constant 0 : index
    %23 = vector.load %arg3[%c1_31, %c0_32, %c0_33, %c0_34] : memref<3x3x128x128xf32, #tpu.memory_space<vmem>>, vector<1x1x128x128xf32>
    %24 = vector.shape_cast %23 : vector<1x1x128x128xf32> to vector<128x128xf32>
    %cst_35 = arith.constant dense<0.000000e+00> : vector<128x128xf32>
    %25 = tpu.matmul %22, %24, %cst_35 {dimension_numbers = #tpu.dot_dimension_numbers<[1], [0], [0], [1], [0, 0, 1, 1], [], []>} : vector<128x128xf32>, vector<128x128xf32>, vector<128x128xf32> -> vector<128x128xf32>
    %26 = arith.addf %19, %25 : vector<128x128xf32>
    %c0_36 = arith.constant 0 : index
    %c0_37 = arith.constant 0 : index
    %c1_38 = arith.constant 1 : index
    %c1_39 = arith.constant 1 : index
    %c0_40 = arith.constant 0 : index
    %27 = vector.load %arg2[%c0_36, %c0_37, %c1_38, %c1_39, %c0_40] : memref<1x1x10x18x128xf32, #tpu.memory_space<vmem>>, vector<1x1x8x16x128xf32>
    %28 = vector.shape_cast %27 : vector<1x1x8x16x128xf32> to vector<8x16x128xf32>
    %29 = vector.shape_cast %28 : vector<8x16x128xf32> to vector<128x128xf32>
    %c1_41 = arith.constant 1 : index
    %c1_42 = arith.constant 1 : index
    %c0_43 = arith.constant 0 : index
    %c0_44 = arith.constant 0 : index
    %30 = vector.load %arg3[%c1_41, %c1_42, %c0_43, %c0_44] : memref<3x3x128x128xf32, #tpu.memory_space<vmem>>, vector<1x1x128x128xf32>
    %31 = vector.shape_cast %30 : vector<1x1x128x128xf32> to vector<128x128xf32>
    %cst_45 = arith.constant dense<0.000000e+00> : vector<128x128xf32>
    %32 = tpu.matmul %29, %31, %cst_45 {dimension_numbers = #tpu.dot_dimension_numbers<[1], [0], [0], [1], [0, 0, 1, 1], [], []>} : vector<128x128xf32>, vector<128x128xf32>, vector<128x128xf32> -> vector<128x128xf32>
    %33 = arith.addf %26, %32 : vector<128x128xf32>
    %c0_46 = arith.constant 0 : index
    %c0_47 = arith.constant 0 : index
    %c1_48 = arith.constant 1 : index
    %c2_49 = arith.constant 2 : index
    %c0_50 = arith.constant 0 : index
    %34 = vector.load %arg2[%c0_46, %c0_47, %c1_48, %c2_49, %c0_50] : memref<1x1x10x18x128xf32, #tpu.memory_space<vmem>>, vector<1x1x8x16x128xf32>
    %35 = vector.shape_cast %34 : vector<1x1x8x16x128xf32> to vector<8x16x128xf32>
    %36 = vector.shape_cast %35 : vector<8x16x128xf32> to vector<128x128xf32>
    %c1_51 = arith.constant 1 : index
    %c2_52 = arith.constant 2 : index
    %c0_53 = arith.constant 0 : index
    %c0_54 = arith.constant 0 : index
    %37 = vector.load %arg3[%c1_51, %c2_52, %c0_53, %c0_54] : memref<3x3x128x128xf32, #tpu.memory_space<vmem>>, vector<1x1x128x128xf32>
    %38 = vector.shape_cast %37 : vector<1x1x128x128xf32> to vector<128x128xf32>
    %cst_55 = arith.constant dense<0.000000e+00> : vector<128x128xf32>
    %39 = tpu.matmul %36, %38, %cst_55 {dimension_numbers = #tpu.dot_dimension_numbers<[1], [0], [0], [1], [0, 0, 1, 1], [], []>} : vector<128x128xf32>, vector<128x128xf32>, vector<128x128xf32> -> vector<128x128xf32>
    %40 = arith.addf %33, %39 : vector<128x128xf32>
    %c0_56 = arith.constant 0 : index
    %c0_57 = arith.constant 0 : index
    %c2_58 = arith.constant 2 : index
    %c0_59 = arith.constant 0 : index
    %c0_60 = arith.constant 0 : index
    %41 = vector.load %arg2[%c0_56, %c0_57, %c2_58, %c0_59, %c0_60] : memref<1x1x10x18x128xf32, #tpu.memory_space<vmem>>, vector<1x1x8x16x128xf32>
    %42 = vector.shape_cast %41 : vector<1x1x8x16x128xf32> to vector<8x16x128xf32>
    %43 = vector.shape_cast %42 : vector<8x16x128xf32> to vector<128x128xf32>
    %c2_61 = arith.constant 2 : index
    %c0_62 = arith.constant 0 : index
    %c0_63 = arith.constant 0 : index
    %c0_64 = arith.constant 0 : index
    %44 = vector.load %arg3[%c2_61, %c0_62, %c0_63, %c0_64] : memref<3x3x128x128xf32, #tpu.memory_space<vmem>>, vector<1x1x128x128xf32>
    %45 = vector.shape_cast %44 : vector<1x1x128x128xf32> to vector<128x128xf32>
    %cst_65 = arith.constant dense<0.000000e+00> : vector<128x128xf32>
    %46 = tpu.matmul %43, %45, %cst_65 {dimension_numbers = #tpu.dot_dimension_numbers<[1], [0], [0], [1], [0, 0, 1, 1], [], []>} : vector<128x128xf32>, vector<128x128xf32>, vector<128x128xf32> -> vector<128x128xf32>
    %47 = arith.addf %40, %46 : vector<128x128xf32>
    %c0_66 = arith.constant 0 : index
    %c0_67 = arith.constant 0 : index
    %c2_68 = arith.constant 2 : index
    %c1_69 = arith.constant 1 : index
    %c0_70 = arith.constant 0 : index
    %48 = vector.load %arg2[%c0_66, %c0_67, %c2_68, %c1_69, %c0_70] : memref<1x1x10x18x128xf32, #tpu.memory_space<vmem>>, vector<1x1x8x16x128xf32>
    %49 = vector.shape_cast %48 : vector<1x1x8x16x128xf32> to vector<8x16x128xf32>
    %50 = vector.shape_cast %49 : vector<8x16x128xf32> to vector<128x128xf32>
    %c2_71 = arith.constant 2 : index
    %c1_72 = arith.constant 1 : index
    %c0_73 = arith.constant 0 : index
    %c0_74 = arith.constant 0 : index
    %51 = vector.load %arg3[%c2_71, %c1_72, %c0_73, %c0_74] : memref<3x3x128x128xf32, #tpu.memory_space<vmem>>, vector<1x1x128x128xf32>
    %52 = vector.shape_cast %51 : vector<1x1x128x128xf32> to vector<128x128xf32>
    %cst_75 = arith.constant dense<0.000000e+00> : vector<128x128xf32>
    %53 = tpu.matmul %50, %52, %cst_75 {dimension_numbers = #tpu.dot_dimension_numbers<[1], [0], [0], [1], [0, 0, 1, 1], [], []>} : vector<128x128xf32>, vector<128x128xf32>, vector<128x128xf32> -> vector<128x128xf32>
    %54 = arith.addf %47, %53 : vector<128x128xf32>
    %c0_76 = arith.constant 0 : index
    %c0_77 = arith.constant 0 : index
    %c2_78 = arith.constant 2 : index
    %c2_79 = arith.constant 2 : index
    %c0_80 = arith.constant 0 : index
    %55 = vector.load %arg2[%c0_76, %c0_77, %c2_78, %c2_79, %c0_80] : memref<1x1x10x18x128xf32, #tpu.memory_space<vmem>>, vector<1x1x8x16x128xf32>
    %56 = vector.shape_cast %55 : vector<1x1x8x16x128xf32> to vector<8x16x128xf32>
    %57 = vector.shape_cast %56 : vector<8x16x128xf32> to vector<128x128xf32>
    %c2_81 = arith.constant 2 : index
    %c2_82 = arith.constant 2 : index
    %c0_83 = arith.constant 0 : index
    %c0_84 = arith.constant 0 : index
    %58 = vector.load %arg3[%c2_81, %c2_82, %c0_83, %c0_84] : memref<3x3x128x128xf32, #tpu.memory_space<vmem>>, vector<1x1x128x128xf32>
    %59 = vector.shape_cast %58 : vector<1x1x128x128xf32> to vector<128x128xf32>
    %cst_85 = arith.constant dense<0.000000e+00> : vector<128x128xf32>
    %60 = tpu.matmul %57, %59, %cst_85 {dimension_numbers = #tpu.dot_dimension_numbers<[1], [0], [0], [1], [0, 0, 1, 1], [], []>} : vector<128x128xf32>, vector<128x128xf32>, vector<128x128xf32> -> vector<128x128xf32>
    %61 = arith.addf %54, %60 : vector<128x128xf32>
    %62 = vector.shape_cast %61 : vector<128x128xf32> to vector<1x8x16x128xf32>
    %c0_86 = arith.constant 0 : index
    %c0_87 = arith.constant 0 : index
    %c0_88 = arith.constant 0 : index
    %c0_89 = arith.constant 0 : index
    %63 = vector.load %arg4[%c0_86, %c0_87, %c0_88, %c0_89] : memref<1x8x16x128xf32, #tpu.memory_space<vmem>>, vector<1x8x16x128xf32>
    tpu.vector_store %arg4[%c0_86, %c0_87, %c0_88, %c0_89], %62 {strides = array<i32>} : memref<1x8x16x128xf32, #tpu.memory_space<vmem>>, vector<1x8x16x128xf32>,
    %cst_90 = arith.constant dense<0.000000e+00> : vector<128xf32>
    %64 = vector.multi_reduction <add>, %61, %cst_90 [0] : vector<128x128xf32> to vector<128xf32>
    %65 = vector.shape_cast %64 : vector<128xf32> to vector<1x128xf32>
    %66 = arith.mulf %61, %61 : vector<128x128xf32>
    %cst_91 = arith.constant dense<0.000000e+00> : vector<128xf32>
    %67 = vector.multi_reduction <add>, %66, %cst_91 [0] : vector<128x128xf32> to vector<128xf32>
    %68 = vector.shape_cast %67 : vector<128xf32> to vector<1x128xf32>
    %69 = tpu.concatenate %65, %68 in 0 : vector<1x128xf32>, vector<1x128xf32> -> vector<2x128xf32>
    %70 = vector.shape_cast %69 : vector<2x128xf32> to vector<1x1x2x128xf32>
    %c0_92 = arith.constant 0 : index
    %c0_93 = arith.constant 0 : index
    %c0_94 = arith.constant 0 : index
    %c0_95 = arith.constant 0 : index
    %71 = vector.load %arg5[%c0_92, %c0_93, %c0_94, %c0_95] : memref<1x1x2x128xf32, #tpu.memory_space<vmem>>, vector<1x1x2x128xf32>
    tpu.vector_store %arg5[%c0_92, %c0_93, %c0_94, %c0_95], %70 {strides = array<i32>} : memref<1x1x2x128xf32, #tpu.memory_space<vmem>>, vector<1x1x2x128xf32>,
    return
  }
  func.func @transform_0(%arg0: i32, %arg1: i32) -> (i32, i32, i32, i32, i32) {
    %c0_i32 = arith.constant 0 : i32
    %c0_i32_0 = arith.constant 0 : i32
    %c0_i32_1 = arith.constant 0 : i32
    %c0_i32_2 = arith.constant 0 : i32
    return %arg0, %arg1, %c0_i32, %c0_i32_0, %c0_i32_1 : i32, i32, i32, i32, i32
  }
  func.func @transform_1(%arg0: i32, %arg1: i32) -> (i32, i32, i32, i32) {
    %c0_i32 = arith.constant 0 : i32
    %c0_i32_0 = arith.constant 0 : i32
    %c0_i32_1 = arith.constant 0 : i32
    %c0_i32_2 = arith.constant 0 : i32
    %c0_i32_3 = arith.constant 0 : i32
    return %c0_i32, %c0_i32_0, %c0_i32_1, %c0_i32_2 : i32, i32, i32, i32
  }
  func.func @transform_2(%arg0: i32, %arg1: i32) -> (i32, i32, i32, i32) {
    %c0_i32 = arith.constant 0 : i32
    %c0_i32_0 = arith.constant 0 : i32
    %c0_i32_1 = arith.constant 0 : i32
    return %arg0, %arg1, %c0_i32, %c0_i32_0 : i32, i32, i32, i32
  }
  func.func @transform_3(%arg0: i32, %arg1: i32) -> (i32, i32, i32, i32) {
    %c0_i32 = arith.constant 0 : i32
    %c0_i32_0 = arith.constant 0 : i32
    %c0_i32_1 = arith.constant 0 : i32
    return %arg0, %arg1, %c0_i32, %c0_i32_0 : i32, i32, i32, i32
  }
}

</mosaic_0001>

<bundles_post_ra>
// kernel: tpu_custom_call.1
= control target key start
LH: loop header
LB: loop body
LE: loop exit
PB: predicated region body
PF: predicated region fallthrough
CT: control target
= control target key end

     0   :  { %9 = vsyncpa [#allocation3], 0  ;;  %s4835_s0 = inlined_call_operand.vmem [shape: f32[2,2,10,18,128], index: 0, kind: input, shape index: {}]   ;;  %s4836_s1 = inlined_call_operand.vmem [shape: f32[3,3,128,128], index: 1, kind: input, shape index: {}]   ;;  %s4837_s2 = inlined_call_operand.hbm [shape: f32[2,16,16,128], index: 2, kind: output, shape index: {0}]   ;;  %s4838_s3 = inlined_call_operand.hbm [shape: f32[2,2,2,128], index: 3, kind: output, shape index: {1}]  }
   0x1   :  { %11 = vsyncpa [#allocation3 + $0x1], 0 }
   0x2   :  { %12 = vsyncpa [#allocation5], 0 }
   0x3   :  { %14 = vsyncpa [#allocation5 + $0x1], 0  ;;  %s3858_s12 = smov 0   ;;  %s3860_s13 = smov 0  }
   0x4   :  { %s3862_s14 = smov 0   ;;  %s3864_s15 = smov 0  }
   0x5   :  { %s3866_s16 = smov 0   ;;  %s3868_s17 = smov 0  }
   0x6   :  { %s3870_s18 = smov 0   ;;  %s3872_s19 = smov 0  }
   0x7 LB: > { %s2159_s20 = sadd.s32 4294967295, %s3832_s19   ;;  %s2160_s21 = sadd.s32 4294967294, %s3832_s19   ;;  %s3832_s19 = sphi %s3872_s19, %s20_s19   ;;  %s3828_s18 = sphi %s3870_s18, %s4847_s18   ;;  %s3824_s17 = sphi %s3868_s17, %s4846_s17   ;;  %s3820_s16 = sphi %s3866_s16, %s4845_s16   ;;  %s3816_s15 = sphi %s3864_s15, %s4844_s15   ;;  %s3812_s14 = sphi %s3862_s14, %s4843_s14   ;;  %s3808_s13 = sphi %s3860_s13, %s4842_s13   ;;  %s3804_s12 = sphi %s3858_s12, %s4841_s12  }
   0x8   : > { %s29_s22 = sadd.s32 1, %s3824_s17  ;;  %s32_s23 = sadd.s32 1, %s3828_s18 }
   0x9   : > { %p30_p0 = scmp.ge.s32.totalorder %s29_s22, 2  ;;  %p100_p1 = scmp.ne.s32.totalorder %s3812_s14, %s3808_s13 }
   0xa   : > { %p101_p2 = scmp.eq.s32.totalorder %s2159_s20, 3  ;;  %p106_p5 = scmp.ne.s32.totalorder %s3808_s13, %s3804_s12 }
   0xb   : > { %s4849_s22 = smov (%p30_p0, %s29_s22), 0  ;;  %s4851_s23 = smov (!%p30_p0, %s32_s23), %s3828_s18 }
   0xc   : > { %s86_s24 = ssub.s32 %s3824_s17, %s4849_s22  ;;  %p3909_p3 = por %p101_p2, %p100_p1 }
   0xd   : > { %p34_p4 = scmp.ge.s32.totalorder %s4851_s23, 2  ;;  %p107_p6 = scmp.eq.s32.totalorder %s2160_s21, 3 }
   0xe   : > { %p2163_p7 = scmp.ge.s32.totalorder %s3832_s19, 1  ;;  %p168_p9 = scmp.lt.s32.totalorder %s3832_s19, 5 }
   0xf   : > { %s4853_s23 = smov (%p34_p4, %s4851_s23), 0  ;;  %p3918_p8 = por %p107_p6, %p106_p5 }
  0x10   : > { %s85_s27 = ssub.s32 %s3828_s18, %s4853_s23  ;;  %s90_s28 = sadd.s32 1, %s3812_s14 }
  0x11   : > { %s87_s29 = sor.u32 %s86_s24, %s85_s27  ;;  %p169_p10 = pnand %p2163_p7, %p168_p9 }
  0x12   : > { %p88_p11 = scmp.eq.s32.totalorder %s87_s29, 0  ;;  %v2167_v0 = vld [vmem:[%s4836_s1 + $0x80] sm:$0xff] (!%p169_p10)  ;;  %v2168_v1 = vld [vmem:[%s4836_s1 + $0x88] sm:$0xff] (!%p169_p10)  ;;  %p201_p12 = scmp.lt.s32.totalorder (!%p169_p10), %s3820_s16, 1  ;;  %v2169_v5 = vld [vmem:[%s4836_s1 + $0x90] sm:$0xff] (!%p169_p10) }
  0x13   : > { %172 = sbr.rel (%p169_p10) target bundleno = 470 (0x1d6), region = 28  ;;  %v2247_v2 = vld [vmem:[%s4836_s1 + $0x200] sm:$0xff] (!%p169_p10)  ;;  %p203_p13 = scmp.lt.s32.totalorder (!%p169_p10), %s3816_s15, 1  ;;  %v3194_v3 = vpack.c.bf16 (!%p169_p10), %v2168_v1, %v2167_v0  ;;  %v2248_v4 = vld [vmem:[%s4836_s1 + $0x208] sm:$0xff] (!%p169_p10)  ;;  %v2170_v6 = vld [vmem:[%s4836_s1 + $0x98] sm:$0xff] (!%p169_p10) }
  0x14   : > { %s3927_s30 = scalar_select %p88_p11, %s3812_s14, %s90_s28  }
  0x15   : > { %v3322_v7 = vpack.c.bf16 (!%p169_p10), %v2248_v4, %v2247_v2  ;;  %v3198_v8 = vpack.c.bf16 (!%p169_p10), %v2170_v6, %v2169_v5  ;;  %v2249_v9 = vld [vmem:[%s4836_s1 + $0x210] sm:$0xff] (!%p169_p10)  ;;  %v2250_v10 = vld [vmem:[%s4836_s1 + $0x218] sm:$0xff] (!%p169_p10)  ;;  %v2171_v11 = vld [vmem:[%s4836_s1 + $0xa0] sm:$0xff] (!%p169_p10)  ;;  %3195 = vmatprep.subr.bf16.mxu1 (!%p169_p10), %v3194_v3  ;;  %s2401_s24 = sshll.u32 (!%p169_p10), %s3816_s15, 4 }
  0x16   : > { %v3326_v12 = vpack.c.bf16 (!%p169_p10), %v2250_v10, %v2249_v9  ;;  %v2172_v13 = vld [vmem:[%s4836_s1 + $0xa8] sm:$0xff] (!%p169_p10)  ;;  %v2251_v14 = vld [vmem:[%s4836_s1 + $0x220] sm:$0xff] (!%p169_p10)  ;;  %3197 = vmatpush3.bf16.msra.mxu1 (!%p169_p10), %v3194_v3  ;;  %v2173_v18 = vld [vmem:[%s4836_s1 + $0xb0] sm:$0xff] (!%p169_p10) }
  0x17   : > { %v2252_v15 = vld [vmem:[%s4836_s1 + $0x228] sm:$0xff] (!%p169_p10)  ;;  %3323 = vmatprep.subr.bf16.mxu0 (!%p169_p10), %v3322_v7  ;;  %3199 = vmatprep.subr.bf16.mxu1 (!%p169_p10), %v3198_v8  ;;  %v3202_v16 = vpack.c.bf16 (!%p169_p10), %v2172_v13, %v2171_v11  ;;  %v2174_v19 = vld [vmem:[%s4836_s1 + $0xb8] sm:$0xff] (!%p169_p10)  ;;  %v2253_v20 = vld [vmem:[%s4836_s1 + $0x230] sm:$0xff] (!%p169_p10) }
  0x18   : > { %3325 = vmatpush3.bf16.msra.mxu0 (!%p169_p10), %v3322_v7  ;;  %v3330_v17 = vpack.c.bf16 (!%p169_p10), %v2252_v15, %v2251_v14  ;;  %v2254_v21 = vld [vmem:[%s4836_s1 + $0x238] sm:$0xff] (!%p169_p10)  ;;  %v3206_v22 = vpack.c.bf16 (!%p169_p10), %v2174_v19, %v2173_v18  ;;  %v2175_v24 = vld [vmem:[%s4836_s1 + $0xc0] sm:$0xff] (!%p169_p10)  ;;  %v2176_v25 = vld [vmem:[%s4836_s1 + $0xc8] sm:$0xff] (!%p169_p10) }
  0x19   : > { %3327 = vmatprep.subr.bf16.mxu0 (!%p169_p10), %v3326_v12  ;;  %v3334_v23 = vpack.c.bf16 (!%p169_p10), %v2254_v21, %v2253_v20  ;;  %v2255_v27 = vld [vmem:[%s4836_s1 + $0x240] sm:$0xff] (!%p169_p10)  ;;  %v2256_v28 = vld [vmem:[%s4836_s1 + $0x248] sm:$0xff] (!%p169_p10)  ;;  %v3210_v30 = vpack.c.bf16 (!%p169_p10), %v2176_v25, %v2175_v24  ;;  %v2177_v32 = vld [vmem:[%s4836_s1 + $0xd0] sm:$0xff] (!%p169_p10) }
  0x1a   : > { %s202_s8 = scalar_select %p201_p12, %s3820_s16, 1  ;;  %3201 = vmatpush3.bf16.msra.mxu1 %v3198_v8  ;;  %v3338_v31 = vpack.c.bf16 %v2256_v28, %v2255_v27  ;;  %v2178_v33 = vld [vmem:[%s4836_s1 + $0xd8] sm:$0xff]  ;;  %v2257_v34 = vld [vmem:[%s4836_s1 + $0x250] sm:$0xff]  ;;  %v2179_v38 = vld [vmem:[%s4836_s1 + $0xe0] sm:$0xff] }
  0x1b   : > { %s204_s27 = scalar_select %p203_p13, %s3816_s15, 1  ;;  %3203 = vmatprep.subr.bf16.mxu1 %v3202_v16  ;;  %v2258_v35 = vld [vmem:[%s4836_s1 + $0x258] sm:$0xff]  ;;  %v3214_v36 = vpack.c.bf16 %v2178_v33, %v2177_v32  ;;  %v2180_v39 = vld [vmem:[%s4836_s1 + $0xe8] sm:$0xff]  ;;  %v2259_v40 = vld [vmem:[%s4836_s1 + $0x260] sm:$0xff] }
  0x1c   : > { %s3627_s28 = smul.u32 60, %s202_s8  ;;  %3329 = vmatpush3.bf16.msra.mxu0 %v3326_v12  ;;  %v3342_v37 = vpack.c.bf16 %v2258_v35, %v2257_v34  ;;  %v2260_v41 = vld [vmem:[%s4836_s1 + $0x268] sm:$0xff]  ;;  %v3218_v42 = vpack.c.bf16 %v2180_v39, %v2179_v38  ;;  %v2181_v44 = vld [vmem:[%s4836_s1 + $0xf0] sm:$0xff]  ;;  %v2182_v45 = vld [vmem:[%s4836_s1 + $0xf8] sm:$0xff]  ;;  %s3834_s8 = smov [#allocation2]  }
  0x1d   : > { %s3626_s29 = smul.u32 30, %s204_s27  ;;  %3331 = vmatprep.subr.bf16.mxu0 %v3330_v17  ;;  %v3346_v43 = vpack.c.bf16 %v2260_v41, %v2259_v40  ;;  %v2261_v46 = vld [vmem:[%s4836_s1 + $0x270] sm:$0xff]  ;;  %v2262_v47 = vld [vmem:[%s4836_s1 + $0x278] sm:$0xff]  ;;  %v3222_v48 = vpack.c.bf16 %v2182_v45, %v2181_v44  ;;  %v227_v50 = vld [vmem:[%s4836_s1] sm:$0xff]  ;;  %s2395_s27 = sshll.u32 %s3820_s16, 5 }
  0x1e   : > { %3205 = vmatpush3.bf16.msra.mxu1 %v3202_v16  ;;  %v3350_v49 = vpack.c.bf16 %v2262_v47, %v2261_v46  ;;  %v228_v51 = vld [vmem:[%s4836_s1 + $0x8] sm:$0xff]  ;;  %v2279_v52 = vld [vmem:[%s4836_s1 + $0x280] sm:$0xff]  ;;  %v229_v56 = vld [vmem:[%s4836_s1 + $0x10] sm:$0xff]  ;;  %s4691_s5 = sadd.s32 %s2401_s24, %s2395_s27 }
  0x1f   : > { %s207_s20 = sadd.s32 %s3627_s28, %s3626_s29  ;;  %3207 = vmatprep.subr.bf16.mxu1 %v3206_v22  ;;  %v2280_v53 = vld [vmem:[%s4836_s1 + $0x288] sm:$0xff]  ;;  %v3226_v54 = vpack.c.bf16 %v228_v51, %v227_v50  ;;  %v230_v57 = vld [vmem:[%s4836_s1 + $0x18] sm:$0xff]  ;;  %v2281_v59 = vld [vmem:[%s4836_s1 + $0x290] sm:$0xff]  ;;  %s2396_s6 = sshll.u32 %s4691_s5, 7 }
  0x20   : > { %s2166_s21 = sshll.u32 %s207_s20, 3  ;;  %3333 = vmatpush3.bf16.msra.mxu0 %v3330_v17  ;;  %v3354_v55 = vpack.c.bf16 %v2280_v53, %v2279_v52  ;;  %v2282_v60 = vld [vmem:[%s4836_s1 + $0x298] sm:$0xff]  ;;  %v3230_v62 = vpack.c.bf16 %v230_v57, %v229_v56  ;;  %v231_v1 = vld [vmem:[%s4836_s1 + $0x20] sm:$0xff]  ;;  %v232_v2 = vld [vmem:[%s4836_s1 + $0x28] sm:$0xff]  ;;  %s4716_s9 = scalar_lea.hbm %s4837_s2, %s2396_s6 }
  0x21   : > { %s3986_s4 = scalar_lea.vmem %s4835_s0, %s2166_s21  ;;  %3335 = vmatprep.subr.bf16.mxu0 %v3334_v23  ;;  %v3358_v0 = vpack.c.bf16 %v2282_v60, %v2281_v59  ;;  %v2283_v3 = vld [vmem:[%s4836_s1 + $0x2a0] sm:$0xff]  ;;  %v2284_v4 = vld [vmem:[%s4836_s1 + $0x2a8] sm:$0xff]  ;;  %v3234_v6 = vpack.c.bf16 %v232_v2, %v231_v1  ;;  %v233_v9 = vld [vmem:[%s4836_s1 + $0x30] sm:$0xff] }
  0x22   : > { %v243_v26 = vld [vmem:[%s3986_s4 + $0x1] sm:$0xff]  ;;  %v4002_v29 = vld [vmem:[%s3986_s4 + $0x19] sm:$0xff]  ;;  %3209 = vmatpush3.bf16.msra.mxu1 %v3206_v22  ;;  %v244_v58 = vld [vmem:[%s3986_s4 + $0x9] sm:$0xff]  ;;  %v3362_v8 = vpack.c.bf16 %v2284_v4, %v2283_v3 }
  0x23   : > { %2722 = vmatprep.mubr.f32.mxu1 %v243_v26  ;;  %2946 = vmatprep.mubr.f32.mxu0 %v4002_v29  ;;  %v2232_v61 = vld [vmem:[%s3986_s4 + $0x21] sm:$0xff]  ;;  %v4068_v63 = vld [vmem:[%s3986_s4 + $0x31] sm:$0xff]  ;;  %v4084_v5 = vld [vmem:[%s3986_s4 + $0x39] sm:$0xff] }
  0x24   : > { %3337 = vmatpush3.bf16.msra.mxu0 %v3334_v23  ;;  %3211 = vmatprep.subr.bf16.mxu1 %v3210_v30  ;;  %v4088_v7 = vld [vmem:[%s3986_s4 + $0x49] sm:$0xff]  ;;  %v234_v10 = vld [vmem:[%s4836_s1 + $0x38] sm:$0xff]  ;;  %v4110_v15 = vld [vmem:[%s3986_s4 + $0x61] sm:$0xff] }
  0x25   : > { %3339 = vmatprep.subr.bf16.mxu0 %v3338_v31  ;;  %v2285_v11 = vld [vmem:[%s4836_s1 + $0x2b0] sm:$0xff]  ;;  %v2286_v12 = vld [vmem:[%s4836_s1 + $0x2b8] sm:$0xff]  ;;  %v3238_v14 = vpack.c.bf16 %v234_v10, %v233_v9  ;;  %v235_v17 = vld [vmem:[%s4836_s1 + $0x40] sm:$0xff] }
  0x26   : > { %3213 = vmatpush3.bf16.msra.mxu1 %v3210_v30  ;;  %v4105_v13 = vld [vmem:[%s3986_s4 + $0x51] sm:$0xff]  ;;  %v3366_v16 = vpack.c.bf16 %v2286_v12, %v2285_v11  ;;  %v236_v18 = vld [vmem:[%s4836_s1 + $0x48] sm:$0xff]  ;;  %v2287_v19 = vld [vmem:[%s4836_s1 + $0x2c0] sm:$0xff] }
  0x27   : > { %3215 = vmatprep.subr.bf16.mxu1 %v3214_v36  ;;  %v2288_v20 = vld [vmem:[%s4836_s1 + $0x2c8] sm:$0xff]  ;;  %v3242_v22 = vpack.c.bf16 %v236_v18, %v235_v17  ;;  %v4132_v23 = vld [vmem:[%s3986_s4 + $0x79] sm:$0xff]  ;;  %v237_v25 = vld [vmem:[%s4836_s1 + $0x50] sm:$0xff] }
  0x28   : > { %3341 = vmatpush3.bf16.msra.mxu0 %v3338_v31  ;;  %v4127_v21 = vld [vmem:[%s3986_s4 + $0x69] sm:$0xff]  ;;  %v3370_v24 = vpack.c.bf16 %v2288_v20, %v2287_v19  ;;  %v238_v26 = vld [vmem:[%s4836_s1 + $0x58] sm:$0xff]  ;;  %v239_v33 = vld [vmem:[%s4836_s1 + $0x60] sm:$0xff] }
  0x29   : > { %3343 = vmatprep.subr.bf16.mxu0 %v3342_v37  ;;  %v2289_v27 = vld [vmem:[%s4836_s1 + $0x2d0] sm:$0xff]  ;;  %v2290_v28 = vld [vmem:[%s4836_s1 + $0x2d8] sm:$0xff]  ;;  %v3246_v30 = vpack.c.bf16 %v238_v26, %v237_v25  ;;  %v240_v34 = vld [vmem:[%s4836_s1 + $0x68] sm:$0xff] }
  0x2a   : > { %3217 = vmatpush3.bf16.msra.mxu1 %v3214_v36  ;;  %v4154_v31 = vld [vmem:[%s3986_s4 + $0x91] sm:$0xff]  ;;  %v3374_v32 = vpack.c.bf16 %v2290_v28, %v2289_v27  ;;  %v2291_v35 = vld [vmem:[%s4836_s1 + $0x2e0] sm:$0xff]  ;;  %v2292_v36 = vld [vmem:[%s4836_s1 + $0x2e8] sm:$0xff]  ;;  %v3250_v38 = vpack.c.bf16 %v240_v34, %v239_v33 }
  0x2b   : > { %3219 = vmatprep.subr.bf16.mxu1 %v3218_v42  ;;  %v4176_v39 = vld [vmem:[%s3986_s4 + $0xa9] sm:$0xff]  ;;  %v3378_v40 = vpack.c.bf16 %v2292_v36, %v2291_v35  ;;  %v2294_v44 = vld [vmem:[%s4836_s1 + $0x2f8] sm:$0xff]  ;;  %v4198_v47 = vld [vmem:[%s3986_s4 + $0xc1] sm:$0xff] }
  0x2c   : > { %3345 = vmatpush3.bf16.msra.mxu0 %v3342_v37  ;;  %v4171_v37 = vld [vmem:[%s3986_s4 + $0x99] sm:$0xff]  ;;  %v241_v41 = vld [vmem:[%s4836_s1 + $0x70] sm:$0xff]  ;;  %v2184_v50 = vld [vmem:[%s4836_s1 + $0x108] sm:$0xff] }
  0x2d   : > { %3347 = vmatprep.subr.bf16.mxu0 %v3346_v43  ;;  %v4193_v45 = vld [vmem:[%s3986_s4 + $0xb1] sm:$0xff]  ;;  %v2311_v51 = vld [vmem:[%s4836_s1 + $0x300] sm:$0xff]  ;;  %v2312_v52 = vld [vmem:[%s4836_s1 + $0x308] sm:$0xff] }
  0x2e   : > { %3221 = vmatpush3.bf16.msra.mxu1 %v3218_v42  ;;  %v242_v42 = vld [vmem:[%s4836_s1 + $0x78] sm:$0xff]  ;;  %v4215_v53 = vld [vmem:[%s3986_s4 + $0xc9] sm:$0xff]  ;;  %v3386_v57 = vpack.c.bf16 %v2312_v52, %v2311_v51  ;;  %v4255_v9 = vld [vmem:[%s3986_s4 + $0x20] sm:$0xff] }
  0x2f   : > { %3223 = vmatprep.subr.bf16.mxu1 %v3222_v48  ;;  %v3254_v46 = vpack.c.bf16 %v242_v42, %v241_v41  ;;  %v4221_v56 = vld [vmem:[%s3986_s4 + $0x1a] sm:$0xff]  ;;  %v212_v60 = vld [vmem:[%s3986_s4 + $0x8] sm:$0xff]  ;;  %v4245_v3 = vld [vmem:[%s3986_s4 + $0x32] sm:$0xff] }
  0x30   : > { %3349 = vmatpush3.bf16.msra.mxu0 %v3346_v43  ;;  %v2293_v43 = vld [vmem:[%s4836_s1 + $0x2f0] sm:$0xff]  ;;  %v2186_v59 = vld [vmem:[%s4836_s1 + $0x118] sm:$0xff]  ;;  %v2315_v10 = vld [vmem:[%s4836_s1 + $0x320] sm:$0xff] }
  0x31   : > { %3351 = vmatprep.subr.bf16.mxu0 %v3350_v49  ;;  %v4242_v1 = vld [vmem:[%s3986_s4 + $0x18] sm:$0xff]  ;;  %v2316_v11 = vld [vmem:[%s4836_s1 + $0x328] sm:$0xff]  ;;  %v2189_v19 = vld [vmem:[%s4836_s1 + $0x130] sm:$0xff] }
  0x32   : > { %3225 = vmatpush3.bf16.msra.mxu1 %v3222_v48  ;;  %v3382_v48 = vpack.c.bf16 %v2294_v44, %v2293_v43  ;;  %v4265_v12 = vld [vmem:[%s3986_s4 + $0x3a] sm:$0xff]  ;;  %v4273_v17 = vld [vmem:[%s3986_s4 + $0x4a] sm:$0xff]  ;;  %v3394_v18 = vpack.c.bf16 %v2316_v11, %v2315_v10  ;;  %v4293_v26 = vld [vmem:[%s3986_s4 + $0x52] sm:$0xff] }
  0x33   : > { %3227 = vmatprep.subr.bf16.mxu1 %v3226_v54  ;;  %v2190_v20 = vld [vmem:[%s4836_s1 + $0x138] sm:$0xff]  ;;  %v4297_v27 = vld [vmem:[%s3986_s4 + $0x48] sm:$0xff]  ;;  %v2191_v33 = vld [vmem:[%s4836_s1 + $0x140] sm:$0xff] }
  0x34   : > { %3353 = vmatpush3.bf16.msra.mxu0 %v3350_v49  ;;  %v2183_v49 = vld [vmem:[%s4836_s1 + $0x100] sm:$0xff]  ;;  %v2318_v25 = vld [vmem:[%s4836_s1 + $0x338] sm:$0xff]  ;;  %v3270_v28 = vpack.c.bf16 %v2190_v20, %v2189_v19  ;;  %v2192_v34 = vld [vmem:[%s4836_s1 + $0x148] sm:$0xff] }
  0x35   : > { %3355 = vmatprep.subr.bf16.mxu0 %v3354_v55  ;;  %2723 = vmatmul.mubr.f32.vlgmr.msra.gmra.mrb[0].mxu1 %v244_v58  ;;  %v2185_v58 = vld [vmem:[%s4836_s1 + $0x110] sm:$0xff]  ;;  %v2319_v36 = vld [vmem:[%s4836_s1 + $0x340] sm:$0xff]  ;;  %v3274_v42 = vpack.c.bf16 %v2192_v34, %v2191_v33  ;;  %v2322_v51 = vld [vmem:[%s4836_s1 + $0x358] sm:$0xff] }
  0x36   : > { %3229 = vmatpush3.bf16.msra.mxu1 %v3226_v54  ;;  %2725 = vmatprep.mubr.f32.mxu1 %v4002_v29  ;;  %v4149_v29 = vld [vmem:[%s3986_s4 + $0x81] sm:$0xff]  ;;  %v3262_v2 = vpack.c.bf16 %v2186_v59, %v2185_v58  ;;  %v4311_v35 = vld [vmem:[%s3986_s4 + $0x50] sm:$0xff]  ;;  %v4395_v19 = vld [vmem:[%s3986_s4 + $0x98] sm:$0xff] }
  0x37   : > { %2947 = vmatmul.mubr.f32.vlgmr.msra.gmra.mrb[0].mxu0 %v2232_v61  ;;  %3231 = vmatprep.subr.bf16.mxu1 %v3230_v62  ;;  %v211_v54 = vld [vmem:[%s3986_s4] sm:$0xff]  ;;  %v4385_v10 = vld [vmem:[%s3986_s4 + $0xaa] sm:$0xff] }
  0x38   : > { %3357 = vmatpush3.bf16.msra.mxu0 %v3354_v55  ;;  %2949 = vmatprep.mubr.f32.mxu0 %v4068_v63  ;;  %v3258_v55 = vpack.c.bf16 %v2184_v50, %v2183_v49  ;;  %v4325_v41 = vld [vmem:[%s3986_s4 + $0x60] sm:$0xff]  ;;  %v4339_v49 = vld [vmem:[%s3986_s4 + $0x68] sm:$0xff]  ;;  %v2321_v50 = vld [vmem:[%s4836_s1 + $0x350] sm:$0xff] }
  0x39   : > { %2726 = vmatmul.mubr.f32.gmra.mrb[2].mxu1 %v2232_v61  ;;  %3359 = vmatprep.subr.bf16.mxu0 %v3358_v0  ;;  %v2313_v61 = vld [vmem:[%s4836_s1 + $0x310] sm:$0xff]  ;;  %v4329_v43 = vld [vmem:[%s3986_s4 + $0x7a] sm:$0xff]  ;;  %v4349_v52 = vld [vmem:[%s3986_s4 + $0x82] sm:$0xff]  ;;  %v3406_v58 = vpack.c.bf16 %v2322_v51, %v2321_v50 }
  0x3a   : > { %3233 = vmatpush3.bf16.msra.mxu1 %v3230_v62  ;;  %2728 = vmatprep.mubr.f32.mxu1 %v4068_v63  ;;  %v2314_v62 = vld [vmem:[%s4836_s1 + $0x318] sm:$0xff]  ;;  %v2195_v59 = vld [vmem:[%s4836_s1 + $0x160] sm:$0xff]  ;;  %v2325_v20 = vld [vmem:[%s4836_s1 + $0x370] sm:$0xff] }
  0x3b   : > { %2950 = vmatmul.mubr.f32.gmra.mrb[2].mxu0 %v4084_v5  ;;  %3235 = vmatprep.subr.bf16.mxu1 %v3234_v6  ;;  %v3390_v4 = vpack.c.bf16 %v2314_v62, %v2313_v61  ;;  %v4367_v61 = vld [vmem:[%s3986_s4 + $0x80] sm:$0xff] }
  0x3c   : > { %3361 = vmatpush3.bf16.msra.mxu0 %v3358_v0  ;;  %2952 = vmatprep.mubr.f32.mxu0 %v4088_v7  ;;  %v4238_v0 = vld [vmem:[%s3986_s4 + $0x22] sm:$0xff] }
  0x3d   : > { %2729 = vmatmul.mubr.f32.gmra.mrb[4].mxu1 %v4084_v5  ;;  %3363 = vmatprep.subr.bf16.mxu0 %v3362_v8  ;;  %v2323_v62 = vld [vmem:[%s4836_s1 + $0x360] sm:$0xff] }
  0x3e   : > { %3237 = vmatpush3.bf16.msra.mxu1 %v3234_v6  ;;  %2731 = vmatprep.mubr.f32.mxu1 %v4088_v7  ;;  %v2187_v6 = vld [vmem:[%s4836_s1 + $0x120] sm:$0xff] }
  0x3f   : > { %2953 = vmatmul.mubr.f32.gmra.mrb[4].mxu0 %v4105_v13  ;;  %3239 = vmatprep.subr.bf16.mxu1 %v3238_v14  ;;  %v4413_v33 = vld [vmem:[%s3986_s4 + $0xc2] sm:$0xff] }
  0x40   : > { %3365 = vmatpush3.bf16.msra.mxu0 %v3362_v8  ;;  %2955 = vmatprep.mubr.f32.mxu0 %v4110_v15  ;;  %v2188_v8 = vld [vmem:[%s4836_s1 + $0x128] sm:$0xff] }
  0x41   : > { %2732 = vmatmul.mubr.f32.gmra.mrb[6].mxu1 %v4105_v13  ;;  %3367 = vmatprep.subr.bf16.mxu0 %v3366_v16  ;;  %v566_v50 = vld [vmem:[%s3986_s4 + $0x2] sm:$0xff] }
  0x42   : > { %3241 = vmatpush3.bf16.msra.mxu1 %v3238_v14  ;;  %2734 = vmatprep.mubr.f32.mxu1 %v4110_v15  ;;  %v4269_v14 = vld [vmem:[%s3986_s4 + $0x30] sm:$0xff] }
  0x43   : > { %2956 = vmatmul.mubr.f32.gmra.mrb[6].mxu0 %v4127_v21  ;;  %3243 = vmatprep.subr.bf16.mxu1 %v3242_v22 }
  0x44   : > { %3369 = vmatpush3.bf16.msra.mxu0 %v3366_v16  ;;  %2958 = vmatprep.mubr.f32.mxu0 %v4132_v23  ;;  %v3266_v16 = vpack.c.bf16 %v2188_v8, %v2187_v6  ;;  %v4381_v6 = vld [vmem:[%s3986_s4 + $0x90] sm:$0xff] }
  0x45   : > { %2735 = vmatmul.mubr.f32.gmra.mrb[8].mxu1 %v4127_v21  ;;  %3371 = vmatprep.subr.bf16.mxu0 %v3370_v24 }
  0x46   : > { %3245 = vmatpush3.bf16.msra.mxu1 %v3242_v22  ;;  %2737 = vmatprep.mubr.f32.mxu1 %v4132_v23  ;;  %v4283_v22 = vld [vmem:[%s3986_s4 + $0x38] sm:$0xff] }
  0x47   : > { %2959 = vmatmul.mubr.f32.gmra.mrb[8].mxu0 %v4149_v29  ;;  %3247 = vmatprep.subr.bf16.mxu1 %v3246_v30 }
  0x48   : > { %3373 = vmatpush3.bf16.msra.mxu0 %v3370_v24  ;;  %2961 = vmatprep.mubr.f32.mxu0 %v4154_v31  ;;  %v2317_v24 = vld [vmem:[%s4836_s1 + $0x330] sm:$0xff] }
  0x49   : > { %2738 = vmatmul.mubr.f32.gmra.mrb[10].mxu1 %v4149_v29  ;;  %3375 = vmatprep.subr.bf16.mxu0 %v3374_v32 }
  0x4a   : > { %3249 = vmatpush3.bf16.msra.mxu1 %v3246_v30  ;;  %2740 = vmatprep.mubr.f32.mxu1 %v4154_v31  ;;  %v4301_v30 = vld [vmem:[%s3986_s4 + $0x62] sm:$0xff] }
  0x4b   : > { %2962 = vmatmul.mubr.f32.gmra.mrb[10].mxu0 %v4171_v37  ;;  %3251 = vmatprep.subr.bf16.mxu1 %v3250_v38 }
  0x4c   : > { %3377 = vmatpush3.bf16.msra.mxu0 %v3374_v32  ;;  %2964 = vmatprep.mubr.f32.mxu0 %v4176_v39  ;;  %v3398_v32 = vpack.c.bf16 %v2318_v25, %v2317_v24  ;;  %v2326_v24 = vld [vmem:[%s4836_s1 + $0x378] sm:$0xff] }
  0x4d   : > { %2741 = vmatmul.mubr.f32.gmra.mrb[12].mxu1 %v4171_v37  ;;  %3379 = vmatprep.subr.bf16.mxu0 %v3378_v40  ;;  %v4405_v25 = vld [vmem:[%s3986_s4 + $0xb2] sm:$0xff]  ;;  %v3414_v34 = vpack.c.bf16 %v2326_v24, %v2325_v20  ;;  %v2347_v20 = vld [vmem:[%s4836_s1 + $0x3a0] sm:$0xff]  ;;  %v2348_v24 = vld [vmem:[%s4836_s1 + $0x3a8] sm:$0xff] }
  0x4e   : > { %3253 = vmatpush3.bf16.msra.mxu1 %v3250_v38  ;;  %2743 = vmatprep.mubr.f32.mxu1 %v4176_v39  ;;  %v2320_v38 = vld [vmem:[%s4836_s1 + $0x348] sm:$0xff] }
  0x4f   : > { %2965 = vmatmul.mubr.f32.gmra.mrb[12].mxu0 %v4193_v45  ;;  %3255 = vmatprep.subr.bf16.mxu1 %v3254_v46  ;;  %v3402_v44 = vpack.c.bf16 %v2320_v38, %v2319_v36  ;;  %v2215_v36 = vld [vmem:[%s4836_s1 + $0x180] sm:$0xff]  ;;  %v2216_v38 = vld [vmem:[%s4836_s1 + $0x188] sm:$0xff] }
  0x50   : > { %3381 = vmatpush3.bf16.msra.mxu0 %v3378_v40  ;;  %2967 = vmatprep.mubr.f32.mxu0 %v4198_v47  ;;  %v4321_v40 = vld [vmem:[%s3986_s4 + $0x6a] sm:$0xff]  ;;  %v3290_v51 = vpack.c.bf16 %v2216_v38, %v2215_v36  ;;  %v2222_v38 = vld [vmem:[%s4836_s1 + $0x1b8] sm:$0xff] }
  0x51   : > { %2744 = vmatmul.mubr.f32.gmra.mrb[14].mxu1 %v4193_v45  ;;  %3383 = vmatprep.subr.bf16.mxu0 %v3382_v48  ;;  %v2221_v36 = vld [vmem:[%s4836_s1 + $0x1b0] sm:$0xff] }
  0x52   : > { %3257 = vmatpush3.bf16.msra.mxu1 %v3254_v46  ;;  %2778 = vmatprep.mubr.f32.mxu1 %v211_v54  ;;  %v2193_v46 = vld [vmem:[%s4836_s1 + $0x150] sm:$0xff]  ;;  %v4353_v54 = vld [vmem:[%s3986_s4 + $0x78] sm:$0xff] }
  0x53   : > { %2968 = vmatmul.mubr.f32.gmra.mrb[14].mxu0 %v4215_v53  ;;  %3259 = vmatprep.subr.bf16.mxu1 %v3258_v55 }
  0x54   : > { %3385 = vmatpush3.bf16.msra.mxu0 %v3382_v48  ;;  %3002 = vmatprep.mubr.f32.mxu0 %v4221_v56  ;;  %v2194_v48 = vld [vmem:[%s4836_s1 + $0x158] sm:$0xff] }
  0x55   : > { %2779 = vmatmul.mubr.f32.vlgmr.msra.gmra.mrb[0].mxu1 %v212_v60  ;;  %3387 = vmatprep.subr.bf16.mxu0 %v3386_v57  ;;  %v2196_v60 = vld [vmem:[%s4836_s1 + $0x168] sm:$0xff] }
  0x56   : > { %3261 = vmatpush3.bf16.msra.mxu1 %v3258_v55  ;;  %2781 = vmatprep.mubr.f32.mxu1 %v4242_v1  ;;  %v3278_v55 = vpack.c.bf16 %v2194_v48, %v2193_v46  ;;  %v3282_v8 = vpack.c.bf16 %v2196_v60, %v2195_v59  ;;  %v2344_v46 = vld [vmem:[%s4836_s1 + $0x388] sm:$0xff]  ;;  %v2218_v59 = vld [vmem:[%s4836_s1 + $0x198] sm:$0xff] }
  0x57   : > { %3003 = vmatmul.mubr.f32.vlgmr.msra.gmra.mrb[0].mxu0 %v4238_v0  ;;  %3263 = vmatprep.subr.bf16.mxu1 %v3262_v2  ;;  %v4433_v48 = vld [vmem:[%s3986_s4 + $0xca] sm:$0xff] }
  0x58   : > { %3389 = vmatpush3.bf16.msra.mxu0 %v3386_v57  ;;  %3005 = vmatprep.mubr.f32.mxu0 %v4245_v3  ;;  %v4357_v57 = vld [vmem:[%s3986_s4 + $0x92] sm:$0xff]  ;;  %v567_v60 = vld [vmem:[%s3986_s4 + $0xa] sm:$0xff] }
  0x59   : > { %2782 = vmatmul.mubr.f32.gmra.mrb[2].mxu1 %v4255_v9  ;;  %3391 = vmatprep.subr.bf16.mxu0 %v3390_v4 }
  0x5a   : > { %3265 = vmatpush3.bf16.msra.mxu1 %v3262_v2  ;;  %2784 = vmatprep.mubr.f32.mxu1 %v4269_v14  ;;  %v2324_v2 = vld [vmem:[%s4836_s1 + $0x368] sm:$0xff] }
  0x5b   : > { %3006 = vmatmul.mubr.f32.gmra.mrb[2].mxu0 %v4265_v12  ;;  %3267 = vmatprep.subr.bf16.mxu1 %v3266_v16  ;;  %v3410_v11 = vpack.c.bf16 %v2324_v2, %v2323_v62  ;;  %v2345_v62 = vld [vmem:[%s4836_s1 + $0x390] sm:$0xff]  ;;  %v2346_v2 = vld [vmem:[%s4836_s1 + $0x398] sm:$0xff] }
  0x5c   : > { %3393 = vmatpush3.bf16.msra.mxu0 %v3390_v4  ;;  %3008 = vmatprep.mubr.f32.mxu0 %v4273_v17  ;;  %v4377_v4 = vld [vmem:[%s3986_s4 + $0x9a] sm:$0xff] }
  0x5d   : > { %2785 = vmatmul.mubr.f32.gmra.mrb[4].mxu1 %v4283_v22  ;;  %3395 = vmatprep.subr.bf16.mxu0 %v3394_v18 }
  0x5e   : > { %3269 = vmatpush3.bf16.msra.mxu1 %v3266_v16  ;;  %2787 = vmatprep.mubr.f32.mxu1 %v4297_v27  ;;  %v2197_v16 = vld [vmem:[%s4836_s1 + $0x170] sm:$0xff] }
  0x5f   : > { %3009 = vmatmul.mubr.f32.gmra.mrb[4].mxu0 %v4293_v26  ;;  %3271 = vmatprep.subr.bf16.mxu1 %v3270_v28 }
  0x60   : > { %3397 = vmatpush3.bf16.msra.mxu0 %v3394_v18  ;;  %3011 = vmatprep.mubr.f32.mxu0 %v4301_v30  ;;  %v2198_v18 = vld [vmem:[%s4836_s1 + $0x178] sm:$0xff] }
  0x61   : > { %2788 = vmatmul.mubr.f32.gmra.mrb[6].mxu1 %v4311_v35  ;;  %3399 = vmatprep.subr.bf16.mxu0 %v3398_v32 }
  0x62   : > { %3273 = vmatpush3.bf16.msra.mxu1 %v3270_v28  ;;  %2790 = vmatprep.mubr.f32.mxu1 %v4325_v41  ;;  %v4409_v28 = vld [vmem:[%s3986_s4 + $0xa8] sm:$0xff] }
  0x63   : > { %3012 = vmatmul.mubr.f32.gmra.mrb[6].mxu0 %v4321_v40  ;;  %3275 = vmatprep.subr.bf16.mxu1 %v3274_v42 }
  0x64   : > { %3401 = vmatpush3.bf16.msra.mxu0 %v3398_v32  ;;  %3014 = vmatprep.mubr.f32.mxu0 %v4329_v43  ;;  %v3286_v32 = vpack.c.bf16 %v2198_v18, %v2197_v16  ;;  %v2219_v16 = vld [vmem:[%s4836_s1 + $0x1a0] sm:$0xff]  ;;  %v2220_v18 = vld [vmem:[%s4836_s1 + $0x1a8] sm:$0xff] }
  0x65   : > { %2791 = vmatmul.mubr.f32.gmra.mrb[8].mxu1 %v4339_v49  ;;  %3403 = vmatprep.subr.bf16.mxu0 %v3402_v44 }
  0x66   : > { %3277 = vmatpush3.bf16.msra.mxu1 %v3274_v42  ;;  %2793 = vmatprep.mubr.f32.mxu1 %v4353_v54  ;;  %v4423_v42 = vld [vmem:[%s3986_s4 + $0xb0] sm:$0xff] }
  0x67   : > { %3015 = vmatmul.mubr.f32.gmra.mrb[8].mxu0 %v4349_v52  ;;  %3279 = vmatprep.subr.bf16.mxu1 %v3278_v55 }
  0x68   : > { %3405 = vmatpush3.bf16.msra.mxu0 %v3402_v44  ;;  %3017 = vmatprep.mubr.f32.mxu0 %v4357_v57  ;;  %v2343_v44 = vld [vmem:[%s4836_s1 + $0x380] sm:$0xff] }
  0x69   : > { %2794 = vmatmul.mubr.f32.gmra.mrb[10].mxu1 %v4367_v61  ;;  %3407 = vmatprep.subr.bf16.mxu0 %v3406_v58 }
  0x6a   : > { %3281 = vmatpush3.bf16.msra.mxu1 %v3278_v55  ;;  %2796 = vmatprep.mubr.f32.mxu1 %v4381_v6  ;;  %v3418_v55 = vpack.c.bf16 %v2344_v46, %v2343_v44  ;;  %v3302_v44 = vpack.c.bf16 %v2222_v38, %v2221_v36  ;;  %v4534_v38 = vld [vmem:[%s3986_s4 + $0xc0] sm:$0xff] }
  0x6b   : > { %3018 = vmatmul.mubr.f32.gmra.mrb[10].mxu0 %v4377_v4  ;;  %3283 = vmatprep.subr.bf16.mxu1 %v3282_v8 }
  0x6c   : > { %3409 = vmatpush3.bf16.msra.mxu0 %v3406_v58  ;;  %3020 = vmatprep.mubr.f32.mxu0 %v4385_v10  ;;  %v2217_v58 = vld [vmem:[%s4836_s1 + $0x190] sm:$0xff] }
  0x6d   : > { %2797 = vmatmul.mubr.f32.gmra.mrb[12].mxu1 %v4395_v19  ;;  %3411 = vmatprep.subr.bf16.mxu0 %v3410_v11 }
  0x6e   : > { %3285 = vmatpush3.bf16.msra.mxu1 %v3282_v8  ;;  %2799 = vmatprep.mubr.f32.mxu1 %v4409_v28  ;;  %v3294_v8 = vpack.c.bf16 %v2218_v59, %v2217_v58  ;;  %v2352_v58 = vld [vmem:[%s4836_s1 + $0x3c8] sm:$0xff] }
  0x6f   : > { %3021 = vmatmul.mubr.f32.gmra.mrb[12].mxu0 %v4405_v25  ;;  %3287 = vmatprep.subr.bf16.mxu1 %v3286_v32 }
  0x70   : > { %3413 = vmatpush3.bf16.msra.mxu0 %v3410_v11  ;;  %3023 = vmatprep.mubr.f32.mxu0 %v4413_v33  ;;  %v3422_v11 = vpack.c.bf16 %v2346_v2, %v2345_v62  ;;  %v2225_v62 = vld [vmem:[%s4836_s1 + $0x1d0] sm:$0xff]  ;;  %v2226_v2 = vld [vmem:[%s4836_s1 + $0x1d8] sm:$0xff] }
  0x71   : > { %2800 = vmatmul.mubr.f32.gmra.mrb[14].mxu1 %v4423_v42  ;;  %3415 = vmatprep.subr.bf16.mxu0 %v3414_v34 }
  0x72   : > { %3289 = vmatpush3.bf16.msra.mxu1 %v3286_v32  ;;  %2834 = vmatprep.mubr.f32.mxu1 %v566_v50  ;;  %v3298_v32 = vpack.c.bf16 %v2220_v18, %v2219_v16  ;;  %v2223_v50 = vld [vmem:[%s4836_s1 + $0x1c0] sm:$0xff]  ;;  %v3310_v16 = vpack.c.bf16 %v2226_v2, %v2225_v62  ;;  %v2376_v62 = vld [vmem:[%s4836_s1 + $0x408] sm:$0xff] }
  0x73   : > { %3024 = vmatmul.mubr.f32.gmra.mrb[14].mxu0 %v4433_v48  ;;  %3291 = vmatprep.subr.bf16.mxu1 %v3290_v51  ;;  %v2310_v2 = vld [vmem:[%s3986_s4 + $0xe0] sm:$0xff] }
  0x74   : > { %3417 = vmatpush3.bf16.msra.mxu0 %v3414_v34  ;;  %3058 = vmatprep.mubr.f32.mxu0 %v4269_v14  ;;  %v3426_v34 = vpack.c.bf16 %v2348_v24, %v2347_v20  ;;  %v2227_v20 = vld [vmem:[%s4836_s1 + $0x1e0] sm:$0xff]  ;;  %v2228_v24 = vld [vmem:[%s4836_s1 + $0x1e8] sm:$0xff] }
  0x75   : > { %2835 = vmatmul.mubr.f32.vlgmr.msra.gmra.mrb[0].mxu1 %v567_v60  ;;  %3419 = vmatprep.subr.bf16.mxu0 %v3418_v55  ;;  %v3314_v36 = vpack.c.bf16 %v2228_v24, %v2227_v20  ;;  %v2379_v20 = vld [vmem:[%s4836_s1 + $0x420] sm:$0xff]  ;;  %v2380_v24 = vld [vmem:[%s4836_s1 + $0x428] sm:$0xff] }
  0x76   : > { %3293 = vmatpush3.bf16.msra.mxu1 %v3290_v51  ;;  %2837 = vmatprep.mubr.f32.mxu1 %v4221_v56  ;;  %v2349_v56 = vld [vmem:[%s4836_s1 + $0x3b0] sm:$0xff]  ;;  %v2224_v51 = vld [vmem:[%s4836_s1 + $0x1c8] sm:$0xff] }
  0x77   : > { %3059 = vmatmul.mubr.f32.vlgmr.msra.gmra.mrb[0].mxu0 %v4283_v22  ;;  %3295 = vmatprep.subr.bf16.mxu1 %v3294_v8  ;;  %v3306_v59 = vpack.c.bf16 %v2224_v51, %v2223_v50  ;;  %v2358_v50 = vld [vmem:[%s4836_s1 + $0x3f8] sm:$0xff]  ;;  %v4551_v51 = vld [vmem:[%s3986_s4 + $0xc8] sm:$0xff] }
  0x78   : > { %3421 = vmatpush3.bf16.msra.mxu0 %v3418_v55  ;;  %3061 = vmatprep.mubr.f32.mxu0 %v4297_v27  ;;  %v2351_v55 = vld [vmem:[%s4836_s1 + $0x3c0] sm:$0xff] }
  0x79   : > { %2838 = vmatmul.mubr.f32.gmra.mrb[2].mxu1 %v4238_v0  ;;  %3423 = vmatprep.subr.bf16.mxu0 %v3422_v11  ;;  %v2350_v0 = vld [vmem:[%s4836_s1 + $0x3b8] sm:$0xff]  ;;  %v3434_v60 = vpack.c.bf16 %v2352_v58, %v2351_v55 }
  0x7a   : > { %3297 = vmatpush3.bf16.msra.mxu1 %v3294_v8  ;;  %2840 = vmatprep.mubr.f32.mxu1 %v4245_v3  ;;  %v3430_v46 = vpack.c.bf16 %v2350_v0, %v2349_v56  ;;  %v2353_v8 = vld [vmem:[%s4836_s1 + $0x3d0] sm:$0xff]  ;;  %v2309_v58 = vld [vmem:[%s3986_s4 + $0xd8] sm:$0xff] }
  0x7b   : > { %3062 = vmatmul.mubr.f32.gmra.mrb[2].mxu0 %v4311_v35  ;;  %3299 = vmatprep.subr.bf16.mxu1 %v3298_v32  ;;  %v2229_v0 = vld [vmem:[%s4836_s1 + $0x1f0] sm:$0xff] }
  0x7c   : > { %3425 = vmatpush3.bf16.msra.mxu0 %v3422_v11  ;;  %3064 = vmatprep.mubr.f32.mxu0 %v4325_v41  ;;  %v2354_v11 = vld [vmem:[%s4836_s1 + $0x3d8] sm:$0xff] }
  0x7d   : > { %2841 = vmatmul.mubr.f32.gmra.mrb[4].mxu1 %v4265_v12  ;;  %3427 = vmatprep.subr.bf16.mxu0 %v3426_v34  ;;  %v3438_v18 = vpack.c.bf16 %v2354_v11, %v2353_v8  ;;  %v2377_v11 = vld [vmem:[%s4836_s1 + $0x410] sm:$0xff] }
  0x7e   : > { %3301 = vmatpush3.bf16.msra.mxu1 %v3298_v32  ;;  %2843 = vmatprep.mubr.f32.mxu1 %v4273_v17  ;;  %v2355_v32 = vld [vmem:[%s4836_s1 + $0x3e0] sm:$0xff] }
  0x7f   : > { %3065 = vmatmul.mubr.f32.gmra.mrb[4].mxu0 %v4339_v49  ;;  %3303 = vmatprep.subr.bf16.mxu1 %v3302_v44 }
  0x80   : > { %3429 = vmatpush3.bf16.msra.mxu0 %v3426_v34  ;;  %3067 = vmatprep.mubr.f32.mxu0 %v4353_v54  ;;  %v2356_v34 = vld [vmem:[%s4836_s1 + $0x3e8] sm:$0xff] }
  0x81   : > { %2844 = vmatmul.mubr.f32.gmra.mrb[6].mxu1 %v4293_v26  ;;  %3431 = vmatprep.subr.bf16.mxu0 %v3430_v46  ;;  %v3442_v56 = vpack.c.bf16 %v2356_v34, %v2355_v32 }
  0x82   : > { %3305 = vmatpush3.bf16.msra.mxu1 %v3302_v44  ;;  %2846 = vmatprep.mubr.f32.mxu1 %v4301_v30  ;;  %v2230_v44 = vld [vmem:[%s4836_s1 + $0x1f8] sm:$0xff] }
  0x83   : > { %3068 = vmatmul.mubr.f32.gmra.mrb[6].mxu0 %v4367_v61  ;;  %3307 = vmatprep.subr.bf16.mxu1 %v3306_v59  ;;  %v3318_v55 = vpack.c.bf16 %v2230_v44, %v2229_v0 }
  0x84   : > { %3433 = vmatpush3.bf16.msra.mxu0 %v3430_v46  ;;  %3070 = vmatprep.mubr.f32.mxu0 %v4381_v6  ;;  %v2357_v46 = vld [vmem:[%s4836_s1 + $0x3f0] sm:$0xff] }
  0x85   : > { %2847 = vmatmul.mubr.f32.gmra.mrb[8].mxu1 %v4321_v40  ;;  %3435 = vmatprep.subr.bf16.mxu0 %v3434_v60 }
  0x86   : > { %3309 = vmatpush3.bf16.msra.mxu1 %v3306_v59  ;;  %2849 = vmatprep.mubr.f32.mxu1 %v4329_v43  ;;  %v3446_v59 = vpack.c.bf16 %v2358_v50, %v2357_v46 }
  0x87   : > { %3071 = vmatmul.mubr.f32.gmra.mrb[8].mxu0 %v4395_v19  ;;  %3311 = vmatprep.subr.bf16.mxu1 %v3310_v16 }
  0x88   : > { %3437 = vmatpush3.bf16.msra.mxu0 %v3434_v60  ;;  %3073 = vmatprep.mubr.f32.mxu0 %v4409_v28  ;;  %v2375_v60 = vld [vmem:[%s4836_s1 + $0x400] sm:$0xff] }
  0x89   : > { %2850 = vmatmul.mubr.f32.gmra.mrb[10].mxu1 %v4349_v52  ;;  %3439 = vmatprep.subr.bf16.mxu0 %v3438_v18  ;;  %v3450_v8 = vpack.c.bf16 %v2376_v62, %v2375_v60 }
  0x8a   : > { %3313 = vmatpush3.bf16.msra.mxu1 %v3310_v16  ;;  %2852 = vmatprep.mubr.f32.mxu1 %v4357_v57  ;;  %v2378_v16 = vld [vmem:[%s4836_s1 + $0x418] sm:$0xff] }
  0x8b   : > { %3074 = vmatmul.mubr.f32.gmra.mrb[10].mxu0 %v4423_v42  ;;  %3315 = vmatprep.subr.bf16.mxu1 %v3314_v36 }
  0x8c   : > { %3441 = vmatpush3.bf16.msra.mxu0 %v3438_v18  ;;  %3076 = vmatprep.mubr.f32.mxu0 %v4534_v38  ;;  %v3454_v18 = vpack.c.bf16 %v2378_v16, %v2377_v11 }
  0x8d   : > { %2853 = vmatmul.mubr.f32.gmra.mrb[12].mxu1 %v4377_v4  ;;  %3443 = vmatprep.subr.bf16.mxu0 %v3442_v56 }
  0x8e   : > { %3317 = vmatpush3.bf16.msra.mxu1 %v3314_v36  ;;  %2855 = vmatprep.mubr.f32.mxu1 %v4385_v10 }
  0x8f   : > { %3077 = vmatmul.mubr.f32.gmra.mrb[12].mxu0 %v4551_v51  ;;  %3319 = vmatprep.subr.bf16.mxu1 %v3318_v55 }
  0x90   : > { %3445 = vmatpush3.bf16.msra.mxu0 %v3442_v56  ;;  %3079 = vmatprep.mubr.f32.mxu0 %v2309_v58 }
  0x91   : > { %2856 = vmatmul.mubr.f32.gmra.mrb[14].mxu1 %v4405_v25  ;;  %3447 = vmatprep.subr.bf16.mxu0 %v3446_v59 }
  0x92   : > { %3321 = vmatpush3.bf16.msra.mxu1 %v3318_v55  ;;  %2890 = vmatprep.mubr.f32.mxu1 %v4242_v1  ;;  %v2381_v1 = vld [vmem:[%s4836_s1 + $0x430] sm:$0xff] }
  0x93   : > { %3080 = vmatmul.mubr.f32.gmra.mrb[14].mxu0 %v2310_v2  ;;  %3482 = vmatprep.subr.bf16.mxu1 %v3450_v8 }
  0x94   : > { %3449 = vmatpush3.bf16.msra.mxu0 %v3446_v59  ;;  %3114 = vmatprep.mubr.f32.mxu0 %v4068_v63  ;;  %v3458_v63 = vpack.c.bf16 %v2380_v24, %v2379_v20 }
  0x95   : > { %3451 = vmatprep.subr.bf16.mxu0 %v3450_v8  ;;  %2891 = vmatmul.mubr.f32.vlgmr.msra.gmra.mrb[0].mxu1 %v4255_v9  ;;  %v2382_v9 = vld [vmem:[%s4836_s1 + $0x438] sm:$0xff] }
  0x96   : > { %3490 = vmatpush3.bf16.msra.mxu1 %v3450_v8  ;;  %2893 = vmatprep.mubr.f32.mxu1 %v4269_v14  ;;  %v2384_v14 = vld [vmem:[%s4836_s1 + $0x448] sm:$0xff] }
  0x97   : > { %3115 = vmatmul.mubr.f32.vlgmr.msra.gmra.mrb[0].mxu0 %v4084_v5  ;;  %3483 = vmatprep.subr.bf16.mxu1 %v3454_v18  ;;  %v3462_v5 = vpack.c.bf16 %v2382_v9, %v2381_v1 }
  0x98   : > { %3453 = vmatpush3.bf16.msra.mxu0 %v3450_v8  ;;  %3117 = vmatprep.mubr.f32.mxu0 %v4088_v7  ;;  %v2383_v7 = vld [vmem:[%s4836_s1 + $0x440] sm:$0xff] }
  0x99   : > { %3455 = vmatprep.subr.bf16.mxu0 %v3454_v18  ;;  %2894 = vmatmul.mubr.f32.gmra.mrb[2].mxu1 %v4283_v22  ;;  %v2386_v22 = vld [vmem:[%s4836_s1 + $0x458] sm:$0xff] }
  0x9a   : > { %3491 = vmatpush3.bf16.msra.mxu1 %v3454_v18  ;;  %2896 = vmatprep.mubr.f32.mxu1 %v4297_v27  ;;  %v2388_v27 = vld [vmem:[%s4836_s1 + $0x468] sm:$0xff] }
  0x9b   : > { %3118 = vmatmul.mubr.f32.gmra.mrb[2].mxu0 %v4105_v13  ;;  %3484 = vmatprep.subr.bf16.mxu1 %v3458_v63  ;;  %v3466_v13 = vpack.c.bf16 %v2384_v14, %v2383_v7 }
  0x9c   : > { %3457 = vmatpush3.bf16.msra.mxu0 %v3454_v18  ;;  %3120 = vmatprep.mubr.f32.mxu0 %v4110_v15  ;;  %v2385_v15 = vld [vmem:[%s4836_s1 + $0x450] sm:$0xff] }
  0x9d   : > { %3459 = vmatprep.subr.bf16.mxu0 %v3458_v63  ;;  %2897 = vmatmul.mubr.f32.gmra.mrb[4].mxu1 %v4311_v35  ;;  %v2341_v35 = vld [vmem:[%s3986_s4 + $0xd9] sm:$0xff] }
  0x9e   : > { %3492 = vmatpush3.bf16.msra.mxu1 %v3458_v63  ;;  %2899 = vmatprep.mubr.f32.mxu1 %v4325_v41  ;;  %v2342_v41 = vld [vmem:[%s3986_s4 + $0xe1] sm:$0xff] }
  0x9f   : > { %3121 = vmatmul.mubr.f32.gmra.mrb[4].mxu0 %v4127_v21  ;;  %3485 = vmatprep.subr.bf16.mxu1 %v3462_v5  ;;  %v3470_v21 = vpack.c.bf16 %v2386_v22, %v2385_v15 }
  0xa0   : > { %3461 = vmatpush3.bf16.msra.mxu0 %v3458_v63  ;;  %3123 = vmatprep.mubr.f32.mxu0 %v4132_v23  ;;  %v2387_v23 = vld [vmem:[%s4836_s1 + $0x460] sm:$0xff] }
  0xa1   : > { %3463 = vmatprep.subr.bf16.mxu0 %v3462_v5  ;;  %2900 = vmatmul.mubr.f32.gmra.mrb[6].mxu1 %v4339_v49 }
  0xa2   : > { %3493 = vmatpush3.bf16.msra.mxu1 %v3462_v5  ;;  %2902 = vmatprep.mubr.f32.mxu1 %v4353_v54 }
  0xa3   : > { %3124 = vmatmul.mubr.f32.gmra.mrb[6].mxu0 %v4149_v29  ;;  %3486 = vmatprep.subr.bf16.mxu1 %v3466_v13  ;;  %v3474_v29 = vpack.c.bf16 %v2388_v27, %v2387_v23 }
  0xa4   : > { %3465 = vmatpush3.bf16.msra.mxu0 %v3462_v5  ;;  %3126 = vmatprep.mubr.f32.mxu0 %v4154_v31  ;;  %v2389_v31 = vld [vmem:[%s4836_s1 + $0x470] sm:$0xff] }
  0xa5   : > { %3467 = vmatprep.subr.bf16.mxu0 %v3466_v13  ;;  %2903 = vmatmul.mubr.f32.gmra.mrb[8].mxu1 %v4367_v61 }
  0xa6   : > { %3494 = vmatpush3.bf16.msra.mxu1 %v3466_v13  ;;  %2905 = vmatprep.mubr.f32.mxu1 %v4381_v6 }
  0xa7   : > { %3127 = vmatmul.mubr.f32.gmra.mrb[8].mxu0 %v4171_v37  ;;  %3487 = vmatprep.subr.bf16.mxu1 %v3470_v21  ;;  %v2390_v37 = vld [vmem:[%s4836_s1 + $0x478] sm:$0xff] }
  0xa8   : > { %3469 = vmatpush3.bf16.msra.mxu0 %v3466_v13  ;;  %3129 = vmatprep.mubr.f32.mxu0 %v4176_v39  ;;  %v3478_v39 = vpack.c.bf16 %v2390_v37, %v2389_v31 }
  0xa9   : > { %3471 = vmatprep.subr.bf16.mxu0 %v3470_v21  ;;  %2906 = vmatmul.mubr.f32.gmra.mrb[10].mxu1 %v4395_v19 }
  0xaa   : > { %3495 = vmatpush3.bf16.msra.mxu1 %v3470_v21  ;;  %2908 = vmatprep.mubr.f32.mxu1 %v4409_v28 }
  0xab   : > { %3130 = vmatmul.mubr.f32.gmra.mrb[10].mxu0 %v4193_v45  ;;  %3488 = vmatprep.subr.bf16.mxu1 %v3474_v29  ;;  %v2373_v45 = vld [vmem:[%s3986_s4 + $0xda] sm:$0xff] }
  0xac   : > { %3473 = vmatpush3.bf16.msra.mxu0 %v3470_v21  ;;  %3132 = vmatprep.mubr.f32.mxu0 %v4198_v47  ;;  %v2374_v47 = vld [vmem:[%s3986_s4 + $0xe2] sm:$0xff]  ;;  %s4665_s4 = sand.u32 1, %s3808_s13  }
  0xad   : > { %3475 = vmatprep.subr.bf16.mxu0 %v3474_v29  ;;  %2909 = vmatmul.mubr.f32.gmra.mrb[12].mxu1 %v4423_v42  ;;  %s2164_s20 = sshll.u32 %s4665_s4, 7  ;;  %s2004_s10 = scalar_lea.sflag [#allocation3], %s4665_s4 }
  0xae   : > { %3496 = vmatpush3.bf16.msra.mxu1 %v3474_v29  ;;  %2911 = vmatprep.mubr.f32.mxu1 %v4534_v38  ;;  %s4672_s21 = scalar_lea.vmem [#allocation2], %s2164_s20  ;;  %s3710_s20 = sshll.u32 %s3834_s8, 4  ;;  %s3711_s20 = int_to_ptr.vmem [resolvable:$false] %s3710_s20 }
  0xaf   : > { %3133 = vmatmul.mubr.f32.gmra.mrb[12].mxu0 %v4215_v53  ;;  %3489 = vmatprep.subr.bf16.mxu1 %v3478_v39  ;;  %s2025_s7 = sshll.u32 %s4672_s21, 4  ;;  %s3712_s24 = scalar_lea.vmem %s3711_s20, 4096  ;;  %s4718_s7 = int_to_ptr.vmem [resolvable:$true] %s2025_s7 }
  0xb0   : > { %3477 = vmatpush3.bf16.msra.mxu0 %v3474_v29  ;;  %3135 = vmatprep.mubr.f32.mxu0 %v2341_v35  ;;  %s3706_s11 = scalar_lea.vmem %s4718_s7, 2048  ;;  %p3713_p4 = scmp.lt.s32.totalorder %s4718_s7, %s3711_s20 }
  0xb1   : > { %3479 = vmatprep.subr.bf16.mxu0 %v3478_v39  ;;  %2912 = vmatmul.mubr.f32.gmra.mrb[14].mxu1 %v4551_v51  ;;  %p3707_p0 = scmp.ne.s32.totalorder %s4718_s7, %s3706_s11  ;;  %p3714_p5 = scmp.lt.s32.totalorder %s3712_s24, %s3706_s11 }
  0xb2   : > { %3497 = vmatpush3.bf16.msra.mxu1 %v3478_v39  ;;  %3182 = vmatprep.mubr.f32.mxu1 %v4357_v57 }
  0xb3   : > { %3136 = vmatmul.mubr.f32.gmra.mrb[14].mxu0 %v2342_v41  ;;  %p3708_p1 = pnand %p3707_p0, %p3909_p3  ;;  %p3715_p6 = por %p3714_p5, %p3713_p4 }
  0xb4   : > { %3481 = vmatpush3.bf16.msra.mxu0 %v3478_v39  ;;  %3170 = vmatprep.mubr.f32.mxu0 %v4245_v3 }
  0xb5   : > { %3183 = vmatmul.mubr.f32.vlgmr.msra.gmra.mrb[16].mxu1 %v4377_v4  ;;  %p3709_p2 = pneg %p3708_p1 }
  0xb6   : > { %3185 = vmatprep.mubr.f32.mxu1 %v4385_v10 }
  0xb7   : > { %3171 = vmatmul.mubr.f32.vlgmr.msra.gmra.mrb[0].mxu0 %v4265_v12  ;;  %p3716_p7 = pnand %p3715_p6, %p3709_p2 }
  0xb8   : > { %3173 = vmatprep.mubr.f32.mxu0 %v4273_v17 }
  0xb9   : > { %3186 = vmatmul.mubr.f32.gmra.mrb[18].mxu1 %v4405_v25 }
  0xba   : > { %3188 = vmatprep.mubr.f32.mxu1 %v4413_v33 }
  0xbb   : > { %3174 = vmatmul.mubr.f32.gmra.mrb[2].mxu0 %v4293_v26 }
  0xbc   : > { %3176 = vmatprep.mubr.f32.mxu0 %v4301_v30 }
  0xbd   : > { %3189 = vmatmul.mubr.f32.gmra.mrb[20].mxu1 %v4433_v48 }
  0xbe   : > { %3191 = vmatprep.mubr.f32.mxu1 %v2373_v45 }
  0xbf   : > { %3177 = vmatmul.mubr.f32.gmra.mrb[4].mxu0 %v4321_v40 }
  0xc0   : > { %3179 = vmatprep.mubr.f32.mxu0 %v4329_v43 }
  0xc1   : > { %3192 = vmatmul.mubr.f32.gmra.mrb[22].mxu1 %v2374_v47 }
  0xc3   : > { %3180 = vmatmul.mubr.f32.gmra.mrb[6].mxu0 %v4349_v52 }
 0x168   : > { %v2892_v53 = vpop.f32.mrb[0].mxu1 }
 0x169   : > { %v860_v3 = vpop.f32.mrb[1].mxu1 }
 0x16c   : > { %v2895_v12 = vpop.f32.mrb[2].mxu1 }
 0x16d   : > { %v870_v17 = vpop.f32.mrb[3].mxu1 }
 0x170   : > { %v4656_v26 = vpop.f32.mrb[4].mxu1 }
 0x171   : > { %v4658_v49 = vpop.f32.mrb[5].mxu1 }
 0x174   : > { %v4660_v30 = vpop.f32.mrb[6].mxu1 }
 0x175   : > { %v4662_v54 = vpop.f32.mrb[7].mxu1 }
 0x178   : > { %v2904_v40 = vpop.f32.mrb[8].mxu1 }
 0x179   : > { %v900_v61 = vpop.f32.mrb[9].mxu1 }
 0x17a   : > { %v3128_v57 = vpop.f32.mrb[8].mxu0 }
 0x17b   : > { %v3506_v43 = vadd.f32 %v3128_v57, %v2904_v40  ;;  %v1677_v4 = vpop.f32.mrb[9].mxu0 }
 0x17c   : > { %v3508_v6 = vadd.f32 %v1677_v4, %v900_v61  ;;  %v2907_v52 = vpop.f32.mrb[10].mxu1 }
 0x17d   : > { %v910_v19 = vpop.f32.mrb[11].mxu1 }
 0x17e   : > { %v3131_v10 = vpop.f32.mrb[10].mxu0 }
 0x17f   : > { %v3510_v25 = vadd.f32 %v3131_v10, %v2907_v52  ;;  %v1687_v28 = vpop.f32.mrb[11].mxu0 }
 0x180   : > { %v3512_v33 = vadd.f32 %v1687_v28, %v910_v19  ;;  %v2910_v42 = vpop.f32.mrb[12].mxu1 }
 0x181   : > { %v920_v32 = vpop.f32.mrb[13].mxu1 }
 0x182   : > { %v3134_v48 = vpop.f32.mrb[12].mxu0 }
 0x183   : > { %v3514_v34 = vadd.f32 %v3134_v48, %v2910_v42  ;;  %v1697_v36 = vpop.f32.mrb[13].mxu0 }
 0x184   : > { %v3516_v38 = vadd.f32 %v1697_v36, %v920_v32  ;;  %v2913_v56 = vpop.f32.mrb[14].mxu1 }
 0x185   : > { %v930_v44 = vpop.f32.mrb[15].mxu1 }
 0x186   : > { %v3137_v0 = vpop.f32.mrb[14].mxu0 }
 0x187   : > { %v3518_v46 = vadd.f32 %v3137_v0, %v2913_v56  ;;  %v1707_v50 = vpop.f32.mrb[15].mxu0 }
 0x188   : > { %v3520_v51 = vadd.f32 %v1707_v50, %v930_v44  ;;  %v3184_v55 = vpop.f32.mrb[16].mxu1 }
 0x189   : > { %v4668_v59 = vadd.f32 %v3506_v43, %v3184_v55  ;;  %v1871_v60 = vpop.f32.mrb[17].mxu1 }
 0x18a   : > { %v3172_v58 = vpop.f32.mrb[0].mxu0  ;;  %v4670_v8 = vadd.f32 %v3508_v6, %v1871_v60 }
 0x18b   : > { %v3498_v62 = vadd.f32 %v3172_v58, %v2892_v53  ;;  %v1831_v2 = vpop.f32.mrb[1].mxu0  ;;  %1935 = vst [vmem:[%s4672_s21 + $0x48] sm:$0xff] %v4668_v59 }
 0x18c   : > { %v3499_v11 = vadd.f32 %v1831_v2, %v860_v3  ;;  %1934 = vst [vmem:[%s4672_s21 + $0x40] sm:$0xff] %v4670_v8  ;;  %v3187_v18 = vpop.f32.mrb[18].mxu1 }
 0x18d   : > { %1927 = vst [vmem:[%s4672_s21 + $0x8] sm:$0xff] %v3498_v62  ;;  %v1964_v16 = vmul.f32 %v3498_v62, %v3498_v62  ;;  %v4680_v1 = vadd.f32 %v3510_v25, %v3187_v18  ;;  %v1881_v9 = vpop.f32.mrb[19].mxu1 }
 0x18e   : > { %1926 = vst [vmem:[%s4672_s21] sm:$0xff] %v3499_v11  ;;  %v1942_v20 = vadd.f32 %v3499_v11, %v3498_v62  ;;  %v1963_v24 = vmul.f32 %v3499_v11, %v3499_v11  ;;  %v3175_v63 = vpop.f32.mrb[2].mxu0  ;;  %v4684_v14 = vadd.f32 %v3512_v33, %v1881_v9 }
 0x18f   : > { %v3500_v5 = vadd.f32 %v3175_v63, %v2895_v12  ;;  %v1841_v7 = vpop.f32.mrb[3].mxu0  ;;  %1937 = vst [vmem:[%s4672_s21 + $0x58] sm:$0xff] %v4680_v1 }
 0x190   : > { %v1979_v13 = vadd.f32 %v1964_v16, %v1963_v24  ;;  %v3501_v15 = vadd.f32 %v1841_v7, %v870_v17  ;;  %1936 = vst [vmem:[%s4672_s21 + $0x50] sm:$0xff] %v4684_v14  ;;  %v3190_v22 = vpop.f32.mrb[20].mxu1 }
 0x191   : > { %1929 = vst [vmem:[%s4672_s21 + $0x18] sm:$0xff] %v3500_v5  ;;  %v4694_v29 = vadd.f32 %v3514_v34, %v3190_v22  ;;  %v1891_v31 = vpop.f32.mrb[21].mxu1  ;;  %v1966_v41 = vmul.f32 %v3500_v5, %v3500_v5 }
 0x192   : > { %1928 = vst [vmem:[%s4672_s21 + $0x10] sm:$0xff] %v3501_v15  ;;  %v1943_v21 = vadd.f32 %v3501_v15, %v1942_v20  ;;  %v1965_v23 = vmul.f32 %v3501_v15, %v3501_v15  ;;  %v3178_v27 = vpop.f32.mrb[4].mxu0  ;;  %v4697_v35 = vadd.f32 %v3516_v38, %v1891_v31 }
 0x193   : > { %v3502_v37 = vadd.f32 %v3178_v27, %v4656_v26  ;;  %v1851_v39 = vpop.f32.mrb[5].mxu0  ;;  %1939 = vst [vmem:[%s4672_s21 + $0x68] sm:$0xff] %v4694_v29 }
 0x194   : > { %v1980_v45 = vadd.f32 %v1979_v13, %v1965_v23  ;;  %v3503_v47 = vadd.f32 %v1851_v39, %v4658_v49  ;;  %v1944_v53 = vadd.f32 %v3500_v5, %v1943_v21  ;;  %1938 = vst [vmem:[%s4672_s21 + $0x60] sm:$0xff] %v4697_v35  ;;  %v3193_v3 = vpop.f32.mrb[22].mxu1 }
 0x195   : > { %1931 = vst [vmem:[%s4672_s21 + $0x28] sm:$0xff] %v3502_v37  ;;  %v4708_v57 = vadd.f32 %v3518_v46, %v3193_v3  ;;  %v1901_v61 = vpop.f32.mrb[23].mxu1  ;;  %v1968_v6 = vmul.f32 %v3502_v37, %v3502_v37 }
 0x196   : > { %1930 = vst [vmem:[%s4672_s21 + $0x20] sm:$0xff] %v3503_v47  ;;  %v1945_v12 = vadd.f32 %v3503_v47, %v1944_v53  ;;  %v1967_v17 = vmul.f32 %v3503_v47, %v3503_v47  ;;  %v1981_v26 = vadd.f32 %v1980_v45, %v1966_v41  ;;  %v3181_v40 = vpop.f32.mrb[6].mxu0  ;;  %v4711_v4 = vadd.f32 %v3520_v51, %v1901_v61 }
 0x197   : > { %v3504_v49 = vadd.f32 %v3181_v40, %v4660_v30  ;;  %v1861_v43 = vpop.f32.mrb[7].mxu0  ;;  %1941 = vst [vmem:[%s4672_s21 + $0x78] sm:$0xff] %v4708_v57 }
 0x198   : > { %v1982_v52 = vadd.f32 %v1981_v26, %v1967_v17  ;;  %v3505_v30 = vadd.f32 %v1861_v43, %v4662_v54  ;;  %v1946_v10 = vadd.f32 %v3502_v37, %v1945_v12  ;;  %1940 = vst [vmem:[%s4672_s21 + $0x70] sm:$0xff] %v4711_v4 }
 0x199   : > { %1933 = vst [vmem:[%s4672_s21 + $0x38] sm:$0xff] %v3504_v49 }
 0x19a   : > { %1932 = vst [vmem:[%s4672_s21 + $0x30] sm:$0xff] %v3505_v30  ;;  %v1947_v19 = vadd.f32 %v3505_v30, %v1946_v10  ;;  %v1969_v25 = vmul.f32 %v3505_v30, %v3505_v30  ;;  %v1983_v28 = vadd.f32 %v1982_v52, %v1968_v6 }
 0x19b   : > { %3719 = shalt.err (!%p3716_p7)
}
 0x19c   : > { %s3720_s21 = scalar_lea.hbm %s4716_s9, 2048  ;;  %s3724_s6 = scalar_lea.hbm %s4837_s2, 8192 }
 0x19d   : > { %p3721_p9 = scmp.ne.s32.totalorder %s4716_s9, %s3720_s21  ;;  %p3725_p12 = scmp.lt.u32.totalorder %s4716_s9, %s4837_s2 }
 0x19e   : > { %p3726_p13 = scmp.lt.u32.totalorder %s3724_s6, %s3720_s21  ;;  %p3728_p1 = scmp.lt.u32.totalorder %s3720_s21, %s4716_s9 }
 0x19f   : > { %p3722_p10 = pnand %p3721_p9, %p3909_p3 }
 0x1a0   : > { %p3727_p0 = por %p3726_p13, %p3725_p12 }
 0x1a1   : > { %p3723_p11 = pneg %p3722_p10 }
 0x1a2   : > { %p3729_p2 = por %p3728_p1, %p3727_p0 }
 0x1a4   : > { %p3730_p4 = pnand %p3729_p2, %p3723_p11 }
 0x1a6   : > { %3733 = shalt.err (!%p3730_p4)
}
 0x1a7   : > { %s3835_s11 = smov 128   ;;  %s3836_s8 = smov 8   ;;  %v1970_v54 = vmul.f32 %v3504_v49, %v3504_v49  ;;  %v1948_v33 = vadd.f32 %v3504_v49, %v1947_v19  ;;  %v1984_v42 = vadd.f32 %v1983_v28, %v1969_v25  ;;  %v1971_v48 = vmul.f32 %v4670_v8, %v4670_v8 }
 0x1a8   : > { %3628 = dma.vmem_to_hbm [thread:$0]  (%p3909_p3), %s4718_s7, 2048, %s4716_s9, %s2004_s10, %s3835_s11, %s3835_s11, %s3836_s8   ;;  %v1972_v36 = vmul.f32 %v4668_v59, %v4668_v59  ;;  %v1973_v0 = vmul.f32 %v4684_v14, %v4684_v14  ;;  %v1974_v50 = vmul.f32 %v4680_v1, %v4680_v1  ;;  %v1975_v58 = vmul.f32 %v4697_v35, %v4697_v35 }
 0x1a9   : > { %v1949_v32 = vadd.f32 %v4670_v8, %v1948_v33  ;;  %v1985_v34 = vadd.f32 %v1984_v42, %v1970_v54  ;;  %v1977_v16 = vmul.f32 %v4711_v4, %v4711_v4  ;;  %v1978_v20 = vmul.f32 %v4708_v57, %v4708_v57  ;;  %s2165_s7 = sshll.u32 %s4665_s4, 1  ;;  %s2397_s9 = sshll.u32 %s3820_s16, 1 }
 0x1aa   : > { %s2039_s10 = sadd.s32 %s3816_s15, %s2397_s9  ;;  %s200_s24 = scalar_lea.vmem [#allocation4], %s2165_s7  ;;  %vm2000_vm0 = vcmask 1040384  }
 0x1ab   : > { %v1950_v38 = vadd.f32 %v4668_v59, %v1949_v32  ;;  %v1986_v56 = vadd.f32 %v1985_v34, %v1971_v48  ;;  %v1976_v59 = vmul.f32 %v4694_v29, %v4694_v29  ;;  %s2398_s20 = sshll.u32 %s2039_s10, 5  ;;  %s2043_s21 = sshll.u32 %s200_s24, 4  ;;  %s4783_s21 = int_to_ptr.vmem [resolvable:$true] %s2043_s21 }
 0x1ac   : > { %s4781_s6 = scalar_lea.hbm %s4838_s3, %s2398_s20  ;;  %s2009_s15 = scalar_lea.sflag [#allocation5], %s4665_s4 }
 0x1ad   : > { %v1987_v44 = vadd.f32 %v1986_v56, %v1972_v36  ;;  %v1951_v46 = vadd.f32 %v4684_v14, %v1950_v38  ;;  %s3734_s16 = scalar_lea.vmem %s4783_s21, 32  ;;  %s3837_s28 = smov [#allocation4]  }
 0x1ae   : > { %p3735_p5 = scmp.ne.s32.totalorder %s4783_s21, %s3734_s16  ;;  %s3738_s29 = sshll.u32 %s3837_s28, 4  ;;  %s3739_s29 = int_to_ptr.vmem [resolvable:$false] %s3738_s29 }
 0x1af   : > { %v1952_v51 = vadd.f32 %v4680_v1, %v1951_v46  ;;  %v1988_v55 = vadd.f32 %v1987_v44, %v1973_v0  ;;  %s3740_s11 = scalar_lea.vmem %s3739_s29, 64  ;;  %p3741_p9 = scmp.lt.s32.totalorder %s4783_s21, %s3739_s29 }
 0x1b0   : > { %p3736_p6 = pnand %p3735_p5, %p3909_p3  ;;  %p3742_p10 = scmp.lt.s32.totalorder %s3740_s11, %s3734_s16 }
 0x1b1   : > { %v1953_v60 = vadd.f32 %v4697_v35, %v1952_v51  ;;  %v1989_v62 = vadd.f32 %v1988_v55, %v1974_v50 }
 0x1b2   : > { %p3737_p7 = pneg %p3736_p6  ;;  %p3743_p11 = por %p3742_p10, %p3741_p9 }
 0x1b3   : > { %v1954_v2 = vadd.f32 %v4694_v29, %v1953_v60  ;;  %v1990_v8 = vadd.f32 %v1989_v62, %v1975_v58 }
 0x1b4   : > { %p3744_p12 = pnand %p3743_p11, %p3737_p7 }
 0x1b5   : > { %v1955_v11 = vadd.f32 %v4711_v4, %v1954_v2  ;;  %v1991_v18 = vadd.f32 %v1990_v8, %v1976_v59 }
 0x1b7   : > { %v1956_v24 = vadd.f32 %v4708_v57, %v1955_v11  ;;  %v1992_v63 = vadd.f32 %v1991_v18, %v1977_v16 }
 0x1b9   : > { %v1957_v1 = vrot.slane %v1956_v24, 4  ;;  %v1993_v9 = vadd.f32 %v1992_v63, %v1978_v20 }
 0x1bb   : > { %v1958_v5 = vadd.f32 %v1957_v1, %v1956_v24  ;;  %v1994_v7 = vrot.slane %v1993_v9, 4 }
 0x1bd   : > { %v1959_v14 = vrot.slane %v1958_v5, 2  ;;  %v1995_v13 = vadd.f32 %v1994_v7, %v1993_v9 }
 0x1bf   : > { %v1960_v15 = vadd.f32 %v1959_v14, %v1958_v5  ;;  %v1996_v22 = vrot.slane %v1995_v13, 2 }
 0x1c1   : > { %v1961_v21 = vrot.slane %v1960_v15, 1  ;;  %v1997_v23 = vadd.f32 %v1996_v22, %v1995_v13 }
 0x1c3   : > { %v1998_v27 = vrot.slane %v1997_v23, 1  ;;  %v1962_v29 = vadd.f32 %v1961_v21, %v1960_v15 }
 0x1c5   : > { %v1999_v31 = vadd.f32 %v1998_v27, %v1997_v23 }
 0x1c7   : > { %v2001_v37 = vsel %vm2000_vm0, %v1962_v29, %v1999_v31 }
 0x1c8   : > { %2002 = vst [vmem:[%s200_s24] sm:$0x3] %v2001_v37 }
 0x1c9   : > { %3747 = shalt.err (!%p3744_p12)
}
 0x1ca   : > { %s3748_s4 = scalar_lea.hbm %s4781_s6, 32  ;;  %s3752_s9 = scalar_lea.hbm %s4838_s3, 128 }
 0x1cb   : > { %p3749_p13 = scmp.ne.s32.totalorder %s4781_s6, %s3748_s4  ;;  %p3753_p2 = scmp.lt.u32.totalorder %s4781_s6, %s4838_s3 }
 0x1cc   : > { %p3754_p4 = scmp.lt.u32.totalorder %s3752_s9, %s3748_s4  ;;  %p3756_p6 = scmp.lt.u32.totalorder %s3748_s4, %s4781_s6 }
 0x1cd   : > { %p3750_p0 = pnand %p3749_p13, %p3909_p3 }
 0x1ce   : > { %p3755_p5 = por %p3754_p4, %p3753_p2 }
 0x1cf   : > { %p3751_p1 = pneg %p3750_p0 }
 0x1d0   : > { %p3757_p7 = por %p3756_p6, %p3755_p5 }
 0x1d2   : > { %p3758_p9 = pnand %p3757_p7, %p3751_p1 }
 0x1d4   : > { %3761 = shalt.err (!%p3758_p9)
}
 0x1d5   : > { %3629 = dma.vmem_to_hbm [thread:$0]  (%p3909_p3), %s4783_s21, 32, %s4781_s6, %s2009_s15  }
 0x1d6 PF: > { %p3639_p10 = scmp.ge.s32.totalorder %s3832_s19, 2  ;;  %s2055_s24 = sand.u32 1, %s3804_s12  }
 0x1d7   : > { %s2056_s27 = scalar_lea.sflag [#allocation3], %s2055_s24 }
 0x1d8   : > { %p3633_p11 = pnand %p3639_p10, %p3918_p8 }
 0x1da   : > { %3795 = dma.done.wait (!%p3633_p11), %s2056_s27, 2048  }
 0x1db   : > { %3797 = vsyncadd (!%p3633_p11), %s2056_s27, 4294965248  ;;  %s2065_s5 = scalar_lea.sflag [#allocation5], %s2055_s24 }
 0x1dc   : > { %3799 = dma.done.wait (!%p3633_p11), %s2065_s5, 32  }
 0x1dd   : > { %3801 = vsyncadd (!%p3633_p11), %s2065_s5, 4294967264  ;;  %s20_s19 = sadd.s32 1, %s3832_s19   ;;  %s4841_s12 = smov %s3808_s13 }
 0x1de   : > { %p17_p12 = scmp.ge.s32.totalorder %s20_s19, 6   ;;  %s4842_s13 = smov %s3812_s14 }
 0x1df   : > { %s4843_s14 = smov %s3927_s30  ;;  %s4844_s15 = smov %s3824_s17 }
 0x1e0   : > { %s4845_s16 = smov %s3828_s18  ;;  %s4846_s17 = smov %s4849_s22 }
 0x1e1   : > { %s4847_s18 = smov %s4853_s23  ;;  %19 = sbr.rel (!%p17_p12) target bundleno = 7 (0x7), region = 90 }
 0x1e8   :  { %2070 = vsyncpa [#allocation3], 1 }
 0x1e9   :  { %2072 = vsyncpa [#allocation3 + $0x1], 1 }
 0x1ea   :  { %2073 = vsyncpa [#allocation5], 1 }
 0x1eb   :  { %2075 = vsyncpa [#allocation5 + $0x1], 1 }

</bundles_post_ra>
